<compile_context>
chip_gen: v6e
topology: v6e:2x2x1
jax: 0.10.0
libtpu: 0.0.40
codegen_flags: <defaults>
</compile_context>

<pallas_src>
import functools

import numpy as np
import jax
import jax.numpy as jnp
from jax.experimental import pallas as pl
from jax.experimental.pallas import tpu as pltpu


# ----------------------------- configuration -------------------------------

CFG = dict(
    idim=40,            # vocabulary size
    odim=80,            # mel dimension
    adim=256,           # attention dim (n_bins == adim)
    aheads=2,
    eunits=256,
    dunits=256,
    elayers=1,
    dlayers=1,
    reduction_factor=1,
    dp_layers=2,        # duration / variance predictor layers
    dp_chans=128,
    dp_kernel=3,
    postnet_layers=2,
    postnet_chans=64,
    postnet_filts=5,
    n_bins=256,
    e_min=0.0, e_max=2.0,
    p_min=0.0, p_max=2.0,
    enc_alpha=1.0, dec_alpha=1.0,
)

_LANES = 128
_ROW_TILE = 256                      # query-row tile for the transformer layer
_VMEM_LIMIT = 48 * 1024 * 1024       # fits v5e/v6e/v7x scoped VMEM comfortably


# --------------------------- small shared helpers ----------------------------

def _round_up(n, m):
    return ((n + m - 1) // m) * m


def _fs(shape):
    """Full-array BlockSpec for a grid=(1,) call."""
    nd = len(shape)
    return pl.BlockSpec(shape, lambda i, nd=nd: (0,) * nd)


def _full_spec(a):
    """Full-array BlockSpec (constant index map) for a 1-D row grid."""
    nd = a.ndim
    return pl.BlockSpec(a.shape, lambda i, nd=nd: (0,) * nd)


def _call(kernel, args, out_shape):
    """grid=(1,) monolithic kernel over full arrays."""
    return pl.pallas_call(
        kernel,
        out_shape=jax.ShapeDtypeStruct(out_shape, jnp.float32),
        grid=(1,),
        in_specs=[_fs(a.shape) for a in args],
        out_specs=_fs(out_shape),
        compiler_params=pltpu.CompilerParams(
            dimension_semantics=("arbitrary",),
            vmem_limit_bytes=_VMEM_LIMIT),
    )(*args)


def _ln(x, g, b, eps=1e-12):          # ESPnet LayerNorm (eps=1e-12)
    mu = jnp.mean(x, axis=-1, keepdims=True)
    var = jnp.mean((x - mu) ** 2, axis=-1, keepdims=True)
    return (x - mu) * jax.lax.rsqrt(var + eps) * g + b


def _conv_taps(y, K, L_real):
    """Stack K shifted copies of y:(L_pad, C) along lanes ('same' padding).

    taps[i, k*C:(k+1)*C] == y[i + k - pad]  if 0 <= i + k - pad < L_real
                            0               otherwise.
    Shifts use pltpu.roll on the sublane axis (XLU) + a boundary mask; the
    single subsequent matmul against the (K*C, Cout) stacked weight replaces
    the former L x L shift-matrix taps.
    """
    L, C = y.shape
    pad = (K - 1) // 2
    rows = jax.lax.broadcasted_iota(jnp.int32, (L, C), 0)
    taps = []
    for k in range(K):
        s = k - pad
        if s == 0:
            taps.append(y)
            continue
        t = pltpu.roll(y, shift=(-s) % L, axis=0)        # t[i] = y[(i+s) % L]
        valid = jnp.logical_and(rows + s >= 0, rows + s < L_real)
        taps.append(jnp.where(valid, t, 0.0))
    return jnp.concatenate(taps, axis=-1)                # (L, K*C)


# ----------------------------- Pallas kernels -------------------------------

def _qkv_kernel(x_ref, ln1_g, ln1_b, wq, bq, wk, bk, wv, bv,
                q_ref, k_ref, v_ref, *, scale):
    """Row tile of: LN1 -> Q/K/V projections.  1/sqrt(dk) folded into Q.

    Outputs are stored bf16 so the attention kernel never re-casts per head.
    """
    hn = _ln(x_ref[...], ln1_g[...], ln1_b[...]).astype(jnp.bfloat16)
    q = jnp.dot(hn, wq[...], preferred_element_type=jnp.float32) + bq[...]
    k = jnp.dot(hn, wk[...], preferred_element_type=jnp.float32) + bk[...]
    v = jnp.dot(hn, wv[...], preferred_element_type=jnp.float32) + bv[...]
    q_ref[...] = (q * scale).astype(jnp.bfloat16)
    k_ref[...] = k.astype(jnp.bfloat16)
    v_ref[...] = v.astype(jnp.bfloat16)


def _attn_ffn_kernel(x_ref, q_ref, k_ref, v_ref, wo, bo, ln2_g, ln2_b,
                     w1, b1, w2, b2, after_g, after_b, o_ref,
                     *, n_heads, apply_after):
    """Per q-row-tile: attention over full K/V + out-proj + residual + LN2 +
    FFN + residual (+ final after-LN).  VMEM is O(tq * L)."""
    x = x_ref[...]                      # (tq, D) f32  (residual input)
    q = q_ref[...]                      # (tq, D) bf16, softmax scale folded in
    k = k_ref[...]                      # (L,  D) bf16, resident across q tiles
    v = v_ref[...]
    D = q.shape[-1]
    dk = D // n_heads                   # 128 == lane width -> free head slices

    wo_v = wo[...]
    attn = None
    for h in range(n_heads):
        sl = slice(h * dk, (h + 1) * dk)
        s = jax.lax.dot_general(q[:, sl], k[:, sl], (((1,), (1,)), ((), ())),
                                preferred_element_type=jnp.float32)
        m = jnp.max(s, axis=-1, keepdims=True)
        e = jnp.exp(s - m)
        p = e * pl.reciprocal(jnp.sum(e, axis=-1, keepdims=True), approx=True)
        ctx = jnp.dot(p.astype(jnp.bfloat16), v[:, sl],
                      preferred_element_type=jnp.float32)
        contrib = jnp.dot(ctx.astype(jnp.bfloat16), wo_v[sl, :],
                          preferred_element_type=jnp.float32)
        attn = contrib if attn is None else attn + contrib
    h1 = x + attn + bo[...]

    hn2 = _ln(h1, ln2_g[...], ln2_b[...]).astype(jnp.bfloat16)
    ff = jnp.dot(hn2, w1[...], preferred_element_type=jnp.float32) + b1[...]
    ff = jnp.maximum(ff, 0.0).astype(jnp.bfloat16)
    ff = jnp.dot(ff, w2[...], preferred_element_type=jnp.float32) + b2[...]
    out = h1 + ff

    if apply_after:                     # final "after" LayerNorm (row-local)
        out = _ln(out, after_g[...], after_b[...])
    o_ref[...] = out


def _variance_kernel(x_ref, *refs, K, n_layers, n_halves, L_real):
    """Fused variance predictor(s): (conv->relu->LN)^n_layers -> Linear.

    refs = [conv_w_stacked, conv_b, ln_g, ln_b] * n_layers + [lin_w, lin_b, out]
    Channel-fused predictors occupy 128-lane halves; LN is applied per half.
    Output (L_pad, 128): predictor p's value sits in lane column p.
    """
    o_ref = refs[-1]
    w = refs[:-1]
    y = x_ref[...]
    half = _LANES
    for li in range(n_layers):
        cw, cb, g, b = w[4 * li:4 * li + 4]
        taps = _conv_taps(y, K, L_real)
        y = jnp.dot(taps.astype(jnp.bfloat16), cw[...],
                    preferred_element_type=jnp.float32) + cb[...]
        y = jnp.maximum(y, 0.0)
        gv, bv = g[...], b[...]
        if n_halves == 1:
            y = _ln(y, gv, bv)
        else:
            y = jnp.concatenate(
                [_ln(y[:, h * half:(h + 1) * half],
                     gv[:, h * half:(h + 1) * half],
                     bv[:, h * half:(h + 1) * half]) for h in range(n_halves)],
                axis=-1)
    lw, lb = w[4 * n_layers], w[4 * n_layers + 1]
    o_ref[...] = jnp.dot(y.astype(jnp.bfloat16), lw[...],
                         preferred_element_type=jnp.float32) + lb[...]


def _feat_postnet_kernel(zs_ref, fw, fb, *refs, K, acts, L_real):
    """feat_out Linear + postnet conv stack + residual, channels padded to 128.

    refs = [w_stacked, b] per postnet layer + [out]
    """
    o_ref = refs[-1]
    layer_refs = refs[:-1]

    zs = zs_ref[...].astype(jnp.bfloat16)
    before = jnp.dot(zs, fw[...], preferred_element_type=jnp.float32) + fb[...]

    h = before
    for li, act in enumerate(acts):
        w, b = layer_refs[2 * li], layer_refs[2 * li + 1]
        taps = _conv_taps(h, K, L_real)
        h = jnp.dot(taps.astype(jnp.bfloat16), w[...],
                    preferred_element_type=jnp.float32) + b[...]
        if act == "tanh":
            h = jnp.tanh(h)
    o_ref[...] = before + h


# ------------------------------- model glue ---------------------------------

@functools.lru_cache(maxsize=None)
def _pe_table(length, d_model):
    pos = np.arange(length, dtype=np.float32)[:, None]
    div = np.exp(np.arange(0, d_model, 2, dtype=np.float32)
                 * -(np.log(10000.0) / d_model))
    pe = np.zeros((length, d_model), np.float32)
    pe[:, 0::2] = np.sin(pos * div)
    pe[:, 1::2] = np.cos(pos * div)
    return pe


def _transformer_layer(x, lp, after_g, after_b, n_heads, apply_after):
    L, D = x.shape
    tq = L if L <= _ROW_TILE else _ROW_TILE
    nt = -(-L // tq)
    scale = 1.0 / float(np.sqrt(D // n_heads))
    row_spec = pl.BlockSpec((tq, D), lambda i: (i, 0))
    cp = pltpu.CompilerParams(dimension_semantics=("parallel",),
                              vmem_limit_bytes=_VMEM_LIMIT)

    qkv_ins = (x, lp["ln1_g"], lp["ln1_b"], lp["Wq"], lp["bq"],
               lp["Wk"], lp["bk"], lp["Wv"], lp["bv"])
    q, k, v = pl.pallas_call(
        functools.partial(_qkv_kernel, scale=scale),
        out_shape=tuple(jax.ShapeDtypeStruct((L, D), jnp.bfloat16)
                        for _ in range(3)),
        grid=(nt,),
        in_specs=[row_spec] + [_full_spec(a) for a in qkv_ins[1:]],
        out_specs=(row_spec, row_spec, row_spec),
        compiler_params=cp,
    )(*qkv_ins)

    attn_ins = (x, q, k, v, lp["Wo"], lp["bo"], lp["ln2_g"], lp["ln2_b"],
                lp["W1"], lp["b1"], lp["W2"], lp["b2"], after_g, after_b)
    out = pl.pallas_call(
        functools.partial(_attn_ffn_kernel, n_heads=n_heads,
                          apply_after=apply_after),
        out_shape=jax.ShapeDtypeStruct((L, D), jnp.float32),
        grid=(nt,),
        in_specs=[row_spec, row_spec, _full_spec(k), _full_spec(v)]
                 + [_full_spec(a) for a in attn_ins[4:]],
        out_specs=row_spec,
        compiler_params=cp,
    )(*attn_ins)
    return out


def transformer_stack(h, layers, after_g, after_b, n_heads):
    n = len(layers)
    for li, lp in enumerate(layers):
        h = _transformer_layer(h, lp, after_g, after_b, n_heads,
                               apply_after=(li == n - 1))
    return h


def variance_predict(x, vp, K, n_layers):
    """Run a (possibly channel-fused) variance predictor; predictor p -> out[:, p]."""
    L = x.shape[0]
    L_pad = _round_up(L, 8)
    x_p = jnp.pad(x, ((0, L_pad - L), (0, 0)))
    n_halves = vp["conv_b"][0].shape[1] // _LANES     # static (from shapes)
    args = [x_p]
    for li in range(n_layers):
        args += [vp["conv_w"][li], vp["conv_b"][li],
                 vp["ln_g"][li], vp["ln_b"][li]]
    args += [vp["lin_w"], vp["lin_b"]]
    out = _call(functools.partial(_variance_kernel, K=K, n_layers=n_layers,
                                  n_halves=n_halves, L_real=L),
                tuple(args), (L_pad, _LANES))
    return out[:L]


def feat_postnet(zs, params):
    L = zs.shape[0]
    L_pad = _round_up(L, 8)
    zs_p = jnp.pad(zs, ((0, L_pad - L), (0, 0)))
    acts = tuple(["tanh"] * (CFG["postnet_layers"] - 1) + [None])
    args = [zs_p, params["feat_out_w_pad"], params["feat_out_b_pad"]]
    for (w, b) in params["postnet"]:
        args += [w, b]
    out = _call(functools.partial(_feat_postnet_kernel,
                                  K=CFG["postnet_filts"], acts=acts, L_real=L),
                tuple(args), (L_pad, _LANES))
    return out[:L]


@jax.jit
def _encoder_half(params, x_tokens, pe_enc):
    cfg = CFG
    xemb = params["embed"][x_tokens]                       # Embedding lookup
    h = xemb + cfg["enc_alpha"] * pe_enc                   # ScaledPositionalEncoding
    hs = transformer_stack(h, params["enc_layers"], params["enc_after_g"],
                           params["enc_after_b"], cfg["aheads"])
    # duration predictor inference: round(exp(d) - 1).clamp(min=0)
    d = variance_predict(hs, params["dur"], cfg["dp_kernel"],
                         cfg["dp_layers"])[:, 0]
    durations = jnp.maximum(jnp.round(jnp.exp(d) - 1.0), 0.0).astype(jnp.int32)
    return hs, durations


@functools.partial(jax.jit, static_argnames=("total_len",))
def _decoder_half(params, hs, durations, pe_dec, total_len):
    cfg = CFG
    # LengthRegulator (on device; total_len is static, fixed by the host sync)
    hs_reg = jnp.repeat(hs, durations, axis=0, total_repeat_length=total_len)

    # pitch + energy predictors channel-fused in one kernel (shared input)
    ve = variance_predict(hs_reg, params["pitch_energy"],
                          cfg["dp_kernel"], cfg["dp_layers"])
    p_val, e_val = ve[:, 0], ve[:, 1]
    p_bins = jnp.linspace(cfg["p_min"], cfg["p_max"], cfg["n_bins"] - 1)
    e_bins = jnp.linspace(cfg["e_min"], cfg["e_max"], cfg["n_bins"] - 1)
    # searchsorted(bins, v, side="left") == number of bins strictly < v
    p_idx = jnp.sum(p_bins[None, :] < p_val[:, None], axis=1)
    e_idx = jnp.sum(e_bins[None, :] < e_val[:, None], axis=1)
    # one_hot @ Linear == embedding row gather (+ bias)
    hs_reg = hs_reg + params["pitch_embed_w"][p_idx] + params["pitch_embed_b"]
    hs_reg = hs_reg + params["energy_embed_w"][e_idx] + params["energy_embed_b"]

    # decoder (input_layer=None -> just ScaledPositionalEncoding, mask=None)
    h = hs_reg + cfg["dec_alpha"] * pe_dec
    zs = transformer_stack(h, params["dec_layers"], params["dec_after_g"],
                           params["dec_after_b"], cfg["aheads"])

    after = feat_postnet(zs, params)                       # (Lr, 128) padded
    return after[:, :cfg["odim"]]                          # == outs[0]


def feed_forward_transformer_forward(x_tokens, params):
    """x_tokens: (T,) int32 token ids.  Returns (L_out, odim) features."""
    T = int(x_tokens.shape[0])
    pe_enc = jnp.asarray(_pe_table(T, CFG["adim"]))
    hs, durations = _encoder_half(params, x_tokens, pe_enc)

    # Data-dependent output length: only the small int duration vector crosses
    # to host to fix the static length; hs stays on device.
    dur = np.asarray(jax.device_get(durations))
    if dur.sum() == 0:                 # ESPnet fallback when all durations == 0
        dur = np.ones_like(dur)
    Lr = int(dur.sum())
    pe_dec = jnp.asarray(_pe_table(Lr, CFG["adim"]))
    return _decoder_half(params, hs, jnp.asarray(dur), pe_dec, total_len=Lr)


# ------------------------------ parameter init ------------------------------

def init_params(key, cfg):
    adim = cfg["adim"]
    K = cfg["dp_kernel"]
    kit = iter(jax.random.split(key, 256))

    def dense(shape, scale=0.02):
        return scale * jax.random.normal(next(kit), shape, dtype=jnp.float32)

    def bf(a):
        return a.astype(jnp.bfloat16)   # MXU operands stored in bf16

    p = {}
    emb = dense((cfg["idim"], adim), scale=0.1)
    p["embed"] = emb.at[0].set(0.0)                 # padding_idx = 0

    def make_block(units):
        return dict(
            ln1_g=jnp.ones((1, adim), jnp.float32),
            ln1_b=jnp.zeros((1, adim), jnp.float32),
            Wq=bf(dense((adim, adim))), bq=jnp.zeros((1, adim), jnp.float32),
            Wk=bf(dense((adim, adim))), bk=jnp.zeros((1, adim), jnp.float32),
            Wv=bf(dense((adim, adim))), bv=jnp.zeros((1, adim), jnp.float32),
            Wo=bf(dense((adim, adim))), bo=jnp.zeros((1, adim), jnp.float32),
            ln2_g=jnp.ones((1, adim), jnp.float32),
            ln2_b=jnp.zeros((1, adim), jnp.float32),
            W1=bf(dense((adim, units))), b1=jnp.zeros((1, units), jnp.float32),
            W2=bf(dense((units, adim))), b2=jnp.zeros((1, adim), jnp.float32),
        )

    p["enc_layers"] = [make_block(cfg["eunits"]) for _ in range(cfg["elayers"])]
    p["enc_after_g"] = jnp.ones((1, adim), jnp.float32)
    p["enc_after_b"] = jnp.zeros((1, adim), jnp.float32)
    p["dec_layers"] = [make_block(cfg["dunits"]) for _ in range(cfg["dlayers"])]
    p["dec_after_g"] = jnp.ones((1, adim), jnp.float32)
    p["dec_after_b"] = jnp.zeros((1, adim), jnp.float32)

    def make_fused_var_predictor(n_pred, lin_biases):
        """n_pred independent predictors channel-fused along 128-lane halves.

        Conv weights are stacked to (K*Cin_total, Cout_total) to match the
        roll-based tap stacking; layers >= 1 are block-diagonal so the fused
        kernel stays equivalent to n_pred independent predictors.
        """
        ch = cfg["dp_chans"]
        ch_tot = ch * n_pred
        conv_w, conv_b, ln_g, ln_b = [], [], [], []
        for li in range(cfg["dp_layers"]):
            cin_p = adim if li == 0 else ch
            per_w = [dense((K, cin_p, ch)) for _ in range(n_pred)]
            if li == 0:
                w_f = jnp.concatenate(per_w, axis=-1)          # shared input
            else:
                w_f = jnp.zeros((K, ch_tot, ch_tot), jnp.float32)
                for pi, wp in enumerate(per_w):
                    w_f = w_f.at[:, pi * ch:(pi + 1) * ch,
                                 pi * ch:(pi + 1) * ch].set(wp)
            cin_tot = w_f.shape[1]
            conv_w.append(bf(w_f.reshape(K * cin_tot, ch_tot)))
            conv_b.append(jnp.zeros((1, ch_tot), jnp.float32))
            ln_g.append(jnp.ones((1, ch_tot), jnp.float32))
            ln_b.append(jnp.zeros((1, ch_tot), jnp.float32))
        # final Linear(n_chans, 1) per predictor -> lane column p (rest zero)
        lin_w = jnp.zeros((ch_tot, _LANES), jnp.float32)
        lin_b = jnp.zeros((1, _LANES), jnp.float32)
        for pi, lbias in enumerate(lin_biases):
            lw = dense((ch, 1))
            lin_w = lin_w.at[pi * ch:(pi + 1) * ch, pi].set(lw[:, 0])
            lin_b = lin_b.at[0, pi].set(lbias)
        return dict(conv_w=conv_w, conv_b=conv_b, ln_g=ln_g, ln_b=ln_b,
                    lin_w=bf(lin_w), lin_b=lin_b)

    p["dur"] = make_fused_var_predictor(1, [1.0])   # durations ~ round(e-1)=2
    p["pitch_energy"] = make_fused_var_predictor(2, [0.9, 0.7])

    p["pitch_embed_w"] = dense((cfg["n_bins"], adim))
    p["pitch_embed_b"] = jnp.zeros((1, adim), jnp.float32)
    p["energy_embed_w"] = dense((cfg["n_bins"], adim))
    p["energy_embed_b"] = jnp.zeros((1, adim), jnp.float32)

    # feat_out padded to 128 lanes (cols >= odim*r are zero and sliced off later)
    odim_r = cfg["odim"] * cfg["reduction_factor"]
    assert cfg["reduction_factor"] == 1 and odim_r <= _LANES
    # TODO(synk): reduction_factor > 1 would need the (B,-1,odim) reshape before
    # the postnet; this config uses r == 1 so the reshape is the identity.
    fw = dense((adim, odim_r))
    p["feat_out_w_pad"] = bf(jnp.zeros((adim, _LANES), jnp.float32)
                             .at[:, :odim_r].set(fw))
    p["feat_out_b_pad"] = jnp.zeros((1, _LANES), jnp.float32)

    # Postnet: Conv1d(bias=False) + eval-mode BatchNorm folded into the conv,
    # channels zero-padded to 128 lanes, taps stacked to (K*128, 128).
    bn_eps = 1e-5
    Kp = cfg["postnet_filts"]

    def folded_conv(cin, cout):
        w = dense((Kp, cin, cout))
        gamma = jnp.ones((cout,), jnp.float32)
        beta = jnp.zeros((cout,), jnp.float32)
        rmean = jnp.zeros((cout,), jnp.float32)
        rvar = jnp.ones((cout,), jnp.float32)
        scale = gamma * jax.lax.rsqrt(rvar + bn_eps)
        w_f = w * scale[None, None, :]
        b_f = (beta - rmean * scale)[None, :]
        w_pad = (jnp.zeros((Kp, _LANES, _LANES), jnp.float32)
                 .at[:, :cin, :cout].set(w_f))
        b_pad = jnp.zeros((1, _LANES), jnp.float32).at[:, :cout].set(b_f)
        return bf(w_pad.reshape(Kp * _LANES, _LANES)), b_pad

    postnet = []
    cin = cfg["odim"]
    for _ in range(cfg["postnet_layers"] - 1):
        postnet.append(folded_conv(cin, cfg["postnet_chans"]))     # + tanh
        cin = cfg["postnet_chans"]
    postnet.append(folded_conv(cin, cfg["odim"]))                  # no tanh
    p["postnet"] = postnet
    return p


# ---------------------------------- main -------------------------------------

if __name__ == "__main__":
    key = jax.random.PRNGKey(0)
    pkey, xkey, hkey = jax.random.split(key, 3)
    params = init_params(pkey, CFG)

    # small end-to-end run (token ids in [1, idim); 0 is the padding index)
    T = 8
    x = jax.random.randint(xkey, (T,), 1, CFG["idim"], dtype=jnp.int32)
    out = feed_forward_transformer_forward(x, params)
    out = jax.block_until_ready(out)
    assert out.ndim == 2 and out.shape[1] == CFG["odim"], out.shape
    assert bool(jnp.all(jnp.isfinite(out)))

    # smoke test of the row-tiled attention path (grid > 1, partial tail tile)
    h_long = 0.02 * jax.random.normal(hkey, (300, CFG["adim"]), dtype=jnp.float32)
    z = transformer_stack(h_long, params["dec_layers"], params["dec_after_g"],
                          params["dec_after_b"], CFG["aheads"])
    z = jax.block_until_ready(z)
    assert z.shape == (300, CFG["adim"]) and bool(jnp.all(jnp.isfinite(z)))

    print("KERNEL_OK")
</pallas_src>

<mosaic_0001>
module attributes {stable_mosaic.version = 11 : i64} {
  func.func @_attn_ffn_kernel(%arg0: i32, %arg1: memref<8x256xf32, #tpu.memory_space<vmem>>, %arg2: memref<8x256xbf16, #tpu.memory_space<vmem>>, %arg3: memref<8x256xbf16, #tpu.memory_space<vmem>>, %arg4: memref<8x256xbf16, #tpu.memory_space<vmem>>, %arg5: memref<256x256xbf16, #tpu.memory_space<vmem>>, %arg6: memref<1x256xf32, #tpu.memory_space<vmem>>, %arg7: memref<1x256xf32, #tpu.memory_space<vmem>>, %arg8: memref<1x256xf32, #tpu.memory_space<vmem>>, %arg9: memref<256x256xbf16, #tpu.memory_space<vmem>>, %arg10: memref<1x256xf32, #tpu.memory_space<vmem>>, %arg11: memref<256x256xbf16, #tpu.memory_space<vmem>>, %arg12: memref<1x256xf32, #tpu.memory_space<vmem>>, %arg13: memref<1x256xf32, #tpu.memory_space<vmem>>, %arg14: memref<1x256xf32, #tpu.memory_space<vmem>>, %arg15: memref<8x256xf32, #tpu.memory_space<vmem>>) attributes {dimension_semantics = [#tpu.dimension_semantics<parallel>], iteration_bounds = array<i64: 1>, scalar_prefetch = 0 : i64, scratch_operands = 0 : i64, tpu.core_type = #tpu.core_type<tc>, window_params = [{transform_indices = @transform_0, window_bounds = array<i64: 8, 256>}, {transform_indices = @transform_1, window_bounds = array<i64: 8, 256>}, {pipeline_mode = #tpu.pipeline_mode<synchronous>, transform_indices = @transform_2, window_bounds = array<i64: 8, 256>}, {pipeline_mode = #tpu.pipeline_mode<synchronous>, transform_indices = @transform_3, window_bounds = array<i64: 8, 256>}, {pipeline_mode = #tpu.pipeline_mode<synchronous>, transform_indices = @transform_4, window_bounds = array<i64: 256, 256>}, {pipeline_mode = #tpu.pipeline_mode<synchronous>, transform_indices = @transform_5, window_bounds = array<i64: 1, 256>}, {pipeline_mode = #tpu.pipeline_mode<synchronous>, transform_indices = @transform_6, window_bounds = array<i64: 1, 256>}, {pipeline_mode = #tpu.pipeline_mode<synchronous>, transform_indices = @transform_7, window_bounds = array<i64: 1, 256>}, {pipeline_mode = #tpu.pipeline_mode<synchronous>, transform_indices = @transform_8, window_bounds = array<i64: 256, 256>}, {pipeline_mode = #tpu.pipeline_mode<synchronous>, transform_indices = @transform_9, window_bounds = array<i64: 1, 256>}, {pipeline_mode = #tpu.pipeline_mode<synchronous>, transform_indices = @transform_10, window_bounds = array<i64: 256, 256>}, {pipeline_mode = #tpu.pipeline_mode<synchronous>, transform_indices = @transform_11, window_bounds = array<i64: 1, 256>}, {pipeline_mode = #tpu.pipeline_mode<synchronous>, transform_indices = @transform_12, window_bounds = array<i64: 1, 256>}, {pipeline_mode = #tpu.pipeline_mode<synchronous>, transform_indices = @transform_13, window_bounds = array<i64: 1, 256>}, {transform_indices = @transform_14, window_bounds = array<i64: 8, 256>}]} {
    %c0 = arith.constant 0 : index
    %c0_0 = arith.constant 0 : index
    %0 = vector.load %arg1[%c0, %c0_0] : memref<8x256xf32, #tpu.memory_space<vmem>>, vector<8x256xf32>
    %c0_1 = arith.constant 0 : index
    %c0_2 = arith.constant 0 : index
    %1 = vector.load %arg2[%c0_1, %c0_2] : memref<8x256xbf16, #tpu.memory_space<vmem>>, vector<8x256xbf16>
    %c0_3 = arith.constant 0 : index
    %c0_4 = arith.constant 0 : index
    %2 = vector.load %arg3[%c0_3, %c0_4] : memref<8x256xbf16, #tpu.memory_space<vmem>>, vector<8x256xbf16>
    %c0_5 = arith.constant 0 : index
    %c0_6 = arith.constant 0 : index
    %3 = vector.load %arg4[%c0_5, %c0_6] : memref<8x256xbf16, #tpu.memory_space<vmem>>, vector<8x256xbf16>
    %c0_7 = arith.constant 0 : index
    %c0_8 = arith.constant 0 : index
    %4 = vector.load %arg5[%c0_7, %c0_8] : memref<256x256xbf16, #tpu.memory_space<vmem>>, vector<256x256xbf16>
    %5 = vector.extract_strided_slice %1 {offsets = [0, 0], sizes = [8, 128], strides = [1, 1]} : vector<8x256xbf16> to vector<8x128xbf16>
    %6 = vector.extract_strided_slice %2 {offsets = [0, 0], sizes = [8, 128], strides = [1, 1]} : vector<8x256xbf16> to vector<8x128xbf16>
    %cst = arith.constant dense<0.000000e+00> : vector<8x8xf32>
    %7 = tpu.matmul %5, %6, %cst {dimension_numbers = #tpu.dot_dimension_numbers<[1], [1], [0], [0], [0, 0, 1, 0], [], []>} : vector<8x128xbf16>, vector<8x128xbf16>, vector<8x8xf32> -> vector<8x8xf32>
    %cst_9 = arith.constant dense<0xFF800000> : vector<8xf32>
    %8 = vector.multi_reduction <maximumf>, %7, %cst_9 [1] : vector<8x8xf32> to vector<8xf32>
    %9 = vector.shape_cast %8 : vector<8xf32> to vector<8x1xf32>
    %10 = vector.broadcast %9 : vector<8x1xf32> to vector<8x8xf32>
    %11 = arith.subf %7, %10 : vector<8x8xf32>
    %12 = math.exp %11 : vector<8x8xf32>
    %cst_10 = arith.constant dense<0.000000e+00> : vector<8xf32>
    %13 = vector.multi_reduction <add>, %12, %cst_10 [1] : vector<8x8xf32> to vector<8xf32>
    %14 = vector.shape_cast %13 : vector<8xf32> to vector<8x1xf32>
    %15 = tpu.reciprocal %14 {approx = true} : vector<8x1xf32> -> vector<8x1xf32>
    %16 = vector.broadcast %15 : vector<8x1xf32> to vector<8x8xf32>
    %17 = arith.mulf %12, %16 : vector<8x8xf32>
    %18 = arith.truncf %17 : vector<8x8xf32> to vector<8x8xbf16>
    %19 = vector.extract_strided_slice %3 {offsets = [0, 0], sizes = [8, 128], strides = [1, 1]} : vector<8x256xbf16> to vector<8x128xbf16>
    %cst_11 = arith.constant dense<0.000000e+00> : vector<8x128xf32>
    %20 = tpu.matmul %18, %19, %cst_11 {dimension_numbers = #tpu.dot_dimension_numbers<[1], [0], [0], [1], [0, 0, 1, 1], [], []>} : vector<8x8xbf16>, vector<8x128xbf16>, vector<8x128xf32> -> vector<8x128xf32>
    %21 = arith.truncf %20 : vector<8x128xf32> to vector<8x128xbf16>
    %22 = vector.extract_strided_slice %4 {offsets = [0, 0], sizes = [128, 256], strides = [1, 1]} : vector<256x256xbf16> to vector<128x256xbf16>
    %cst_12 = arith.constant dense<0.000000e+00> : vector<8x256xf32>
    %23 = tpu.matmul %21, %22, %cst_12 {dimension_numbers = #tpu.dot_dimension_numbers<[1], [0], [0], [1], [0, 0, 1, 1], [], []>} : vector<8x128xbf16>, vector<128x256xbf16>, vector<8x256xf32> -> vector<8x256xf32>
    %24 = vector.extract_strided_slice %1 {offsets = [0, 128], sizes = [8, 128], strides = [1, 1]} : vector<8x256xbf16> to vector<8x128xbf16>
    %25 = vector.extract_strided_slice %2 {offsets = [0, 128], sizes = [8, 128], strides = [1, 1]} : vector<8x256xbf16> to vector<8x128xbf16>
    %cst_13 = arith.constant dense<0.000000e+00> : vector<8x8xf32>
    %26 = tpu.matmul %24, %25, %cst_13 {dimension_numbers = #tpu.dot_dimension_numbers<[1], [1], [0], [0], [0, 0, 1, 0], [], []>} : vector<8x128xbf16>, vector<8x128xbf16>, vector<8x8xf32> -> vector<8x8xf32>
    %cst_14 = arith.constant dense<0xFF800000> : vector<8xf32>
    %27 = vector.multi_reduction <maximumf>, %26, %cst_14 [1] : vector<8x8xf32> to vector<8xf32>
    %28 = vector.shape_cast %27 : vector<8xf32> to vector<8x1xf32>
    %29 = vector.broadcast %28 : vector<8x1xf32> to vector<8x8xf32>
    %30 = arith.subf %26, %29 : vector<8x8xf32>
    %31 = math.exp %30 : vector<8x8xf32>
    %cst_15 = arith.constant dense<0.000000e+00> : vector<8xf32>
    %32 = vector.multi_reduction <add>, %31, %cst_15 [1] : vector<8x8xf32> to vector<8xf32>
    %33 = vector.shape_cast %32 : vector<8xf32> to vector<8x1xf32>
    %34 = tpu.reciprocal %33 {approx = true} : vector<8x1xf32> -> vector<8x1xf32>
    %35 = vector.broadcast %34 : vector<8x1xf32> to vector<8x8xf32>
    %36 = arith.mulf %31, %35 : vector<8x8xf32>
    %37 = arith.truncf %36 : vector<8x8xf32> to vector<8x8xbf16>
    %38 = vector.extract_strided_slice %3 {offsets = [0, 128], sizes = [8, 128], strides = [1, 1]} : vector<8x256xbf16> to vector<8x128xbf16>
    %cst_16 = arith.constant dense<0.000000e+00> : vector<8x128xf32>
    %39 = tpu.matmul %37, %38, %cst_16 {dimension_numbers = #tpu.dot_dimension_numbers<[1], [0], [0], [1], [0, 0, 1, 1], [], []>} : vector<8x8xbf16>, vector<8x128xbf16>, vector<8x128xf32> -> vector<8x128xf32>
    %40 = arith.truncf %39 : vector<8x128xf32> to vector<8x128xbf16>
    %41 = vector.extract_strided_slice %4 {offsets = [128, 0], sizes = [128, 256], strides = [1, 1]} : vector<256x256xbf16> to vector<128x256xbf16>
    %cst_17 = arith.constant dense<0.000000e+00> : vector<8x256xf32>
    %42 = tpu.matmul %40, %41, %cst_17 {dimension_numbers = #tpu.dot_dimension_numbers<[1], [0], [0], [1], [0, 0, 1, 1], [], []>} : vector<8x128xbf16>, vector<128x256xbf16>, vector<8x256xf32> -> vector<8x256xf32>
    %43 = arith.addf %23, %42 : vector<8x256xf32>
    %44 = arith.addf %0, %43 : vector<8x256xf32>
    %c0_18 = arith.constant 0 : index
    %c0_19 = arith.constant 0 : index
    %45 = vector.load %arg6[%c0_18, %c0_19] : memref<1x256xf32, #tpu.memory_space<vmem>>, vector<1x256xf32>
    %46 = vector.broadcast %45 : vector<1x256xf32> to vector<8x256xf32>
    %47 = arith.addf %44, %46 : vector<8x256xf32>
    %c0_20 = arith.constant 0 : index
    %c0_21 = arith.constant 0 : index
    %48 = vector.load %arg7[%c0_20, %c0_21] : memref<1x256xf32, #tpu.memory_space<vmem>>, vector<1x256xf32>
    %c0_22 = arith.constant 0 : index
    %c0_23 = arith.constant 0 : index
    %49 = vector.load %arg8[%c0_22, %c0_23] : memref<1x256xf32, #tpu.memory_space<vmem>>, vector<1x256xf32>
    %cst_24 = arith.constant dense<0.000000e+00> : vector<8xf32>
    %50 = vector.multi_reduction <add>, %47, %cst_24 [1] : vector<8x256xf32> to vector<8xf32>
    %51 = vector.shape_cast %50 : vector<8xf32> to vector<8x1xf32>
    %cst_25 = arith.constant 2.560000e+02 : f32
    %52 = vector.broadcast %cst_25 : f32 to vector<8x1xf32>
    %53 = arith.divf %51, %52 : vector<8x1xf32>
    %54 = vector.broadcast %53 : vector<8x1xf32> to vector<8x256xf32>
    %55 = arith.subf %47, %54 : vector<8x256xf32>
    %56 = arith.mulf %55, %55 : vector<8x256xf32>
    %cst_26 = arith.constant dense<0.000000e+00> : vector<8xf32>
    %57 = vector.multi_reduction <add>, %56, %cst_26 [1] : vector<8x256xf32> to vector<8xf32>
    %58 = vector.shape_cast %57 : vector<8xf32> to vector<8x1xf32>
    %cst_27 = arith.constant 2.560000e+02 : f32
    %59 = vector.broadcast %cst_27 : f32 to vector<8x1xf32>
    %60 = arith.divf %58, %59 : vector<8x1xf32>
    %61 = vector.broadcast %53 : vector<8x1xf32> to vector<8x256xf32>
    %62 = arith.subf %47, %61 : vector<8x256xf32>
    %cst_28 = arith.constant 9.99999996E-13 : f32
    %63 = vector.broadcast %cst_28 : f32 to vector<8x1xf32>
    %64 = arith.addf %60, %63 : vector<8x1xf32>
    %65 = math.rsqrt %64 : vector<8x1xf32>
    %66 = vector.broadcast %65 : vector<8x1xf32> to vector<8x256xf32>
    %67 = arith.mulf %62, %66 : vector<8x256xf32>
    %68 = vector.broadcast %48 : vector<1x256xf32> to vector<8x256xf32>
    %69 = arith.mulf %67, %68 : vector<8x256xf32>
    %70 = vector.broadcast %49 : vector<1x256xf32> to vector<8x256xf32>
    %71 = arith.addf %69, %70 : vector<8x256xf32>
    %72 = arith.truncf %71 : vector<8x256xf32> to vector<8x256xbf16>
    %c0_29 = arith.constant 0 : index
    %c0_30 = arith.constant 0 : index
    %73 = vector.load %arg9[%c0_29, %c0_30] : memref<256x256xbf16, #tpu.memory_space<vmem>>, vector<256x256xbf16>
    %cst_31 = arith.constant dense<0.000000e+00> : vector<8x256xf32>
    %74 = tpu.matmul %72, %73, %cst_31 {dimension_numbers = #tpu.dot_dimension_numbers<[1], [0], [0], [1], [0, 0, 1, 1], [], []>} : vector<8x256xbf16>, vector<256x256xbf16>, vector<8x256xf32> -> vector<8x256xf32>
    %c0_32 = arith.constant 0 : index
    %c0_33 = arith.constant 0 : index
    %75 = vector.load %arg10[%c0_32, %c0_33] : memref<1x256xf32, #tpu.memory_space<vmem>>, vector<1x256xf32>
    %76 = vector.broadcast %75 : vector<1x256xf32> to vector<8x256xf32>
    %77 = arith.addf %74, %76 : vector<8x256xf32>
    %cst_34 = arith.constant 0.000000e+00 : f32
    %78 = vector.broadcast %cst_34 : f32 to vector<8x256xf32>
    %79 = arith.maximumf %77, %78 : vector<8x256xf32>
    %80 = arith.truncf %79 : vector<8x256xf32> to vector<8x256xbf16>
    %c0_35 = arith.constant 0 : index
    %c0_36 = arith.constant 0 : index
    %81 = vector.load %arg11[%c0_35, %c0_36] : memref<256x256xbf16, #tpu.memory_space<vmem>>, vector<256x256xbf16>
    %cst_37 = arith.constant dense<0.000000e+00> : vector<8x256xf32>
    %82 = tpu.matmul %80, %81, %cst_37 {dimension_numbers = #tpu.dot_dimension_numbers<[1], [0], [0], [1], [0, 0, 1, 1], [], []>} : vector<8x256xbf16>, vector<256x256xbf16>, vector<8x256xf32> -> vector<8x256xf32>
    %c0_38 = arith.constant 0 : index
    %c0_39 = arith.constant 0 : index
    %83 = vector.load %arg12[%c0_38, %c0_39] : memref<1x256xf32, #tpu.memory_space<vmem>>, vector<1x256xf32>
    %84 = vector.broadcast %83 : vector<1x256xf32> to vector<8x256xf32>
    %85 = arith.addf %82, %84 : vector<8x256xf32>
    %86 = arith.addf %47, %85 : vector<8x256xf32>
    %c0_40 = arith.constant 0 : index
    %c0_41 = arith.constant 0 : index
    %87 = vector.load %arg13[%c0_40, %c0_41] : memref<1x256xf32, #tpu.memory_space<vmem>>, vector<1x256xf32>
    %c0_42 = arith.constant 0 : index
    %c0_43 = arith.constant 0 : index
    %88 = vector.load %arg14[%c0_42, %c0_43] : memref<1x256xf32, #tpu.memory_space<vmem>>, vector<1x256xf32>
    %cst_44 = arith.constant dense<0.000000e+00> : vector<8xf32>
    %89 = vector.multi_reduction <add>, %86, %cst_44 [1] : vector<8x256xf32> to vector<8xf32>
    %90 = vector.shape_cast %89 : vector<8xf32> to vector<8x1xf32>
    %cst_45 = arith.constant 2.560000e+02 : f32
    %91 = vector.broadcast %cst_45 : f32 to vector<8x1xf32>
    %92 = arith.divf %90, %91 : vector<8x1xf32>
    %93 = vector.broadcast %92 : vector<8x1xf32> to vector<8x256xf32>
    %94 = arith.subf %86, %93 : vector<8x256xf32>
    %95 = arith.mulf %94, %94 : vector<8x256xf32>
    %cst_46 = arith.constant dense<0.000000e+00> : vector<8xf32>
    %96 = vector.multi_reduction <add>, %95, %cst_46 [1] : vector<8x256xf32> to vector<8xf32>
    %97 = vector.shape_cast %96 : vector<8xf32> to vector<8x1xf32>
    %cst_47 = arith.constant 2.560000e+02 : f32
    %98 = vector.broadcast %cst_47 : f32 to vector<8x1xf32>
    %99 = arith.divf %97, %98 : vector<8x1xf32>
    %100 = vector.broadcast %92 : vector<8x1xf32> to vector<8x256xf32>
    %101 = arith.subf %86, %100 : vector<8x256xf32>
    %cst_48 = arith.constant 9.99999996E-13 : f32
    %102 = vector.broadcast %cst_48 : f32 to vector<8x1xf32>
    %103 = arith.addf %99, %102 : vector<8x1xf32>
    %104 = math.rsqrt %103 : vector<8x1xf32>
    %105 = vector.broadcast %104 : vector<8x1xf32> to vector<8x256xf32>
    %106 = arith.mulf %101, %105 : vector<8x256xf32>
    %107 = vector.broadcast %87 : vector<1x256xf32> to vector<8x256xf32>
    %108 = arith.mulf %106, %107 : vector<8x256xf32>
    %109 = vector.broadcast %88 : vector<1x256xf32> to vector<8x256xf32>
    %110 = arith.addf %108, %109 : vector<8x256xf32>
    %c0_49 = arith.constant 0 : index
    %c0_50 = arith.constant 0 : index
    %111 = vector.load %arg15[%c0_49, %c0_50] : memref<8x256xf32, #tpu.memory_space<vmem>>, vector<8x256xf32>
    tpu.vector_store %arg15[%c0_49, %c0_50], %110 {strides = array<i32>} : memref<8x256xf32, #tpu.memory_space<vmem>>, vector<8x256xf32>,
    return
  }
  func.func @transform_0(%arg0: i32) -> (i32, i32) {
    %c0_i32 = arith.constant 0 : i32
    %c0_i32_0 = arith.constant 0 : i32
    return %arg0, %c0_i32 : i32, i32
  }
  func.func @transform_1(%arg0: i32) -> (i32, i32) {
    %c0_i32 = arith.constant 0 : i32
    %c0_i32_0 = arith.constant 0 : i32
    return %arg0, %c0_i32 : i32, i32
  }
  func.func @transform_2(%arg0: i32) -> (i32, i32) {
    %c0_i32 = arith.constant 0 : i32
    %c0_i32_0 = arith.constant 0 : i32
    %c0_i32_1 = arith.constant 0 : i32
    return %c0_i32, %c0_i32_0 : i32, i32
  }
  func.func @transform_3(%arg0: i32) -> (i32, i32) {
    %c0_i32 = arith.constant 0 : i32
    %c0_i32_0 = arith.constant 0 : i32
    %c0_i32_1 = arith.constant 0 : i32
    return %c0_i32, %c0_i32_0 : i32, i32
  }
  func.func @transform_4(%arg0: i32) -> (i32, i32) {
    %c0_i32 = arith.constant 0 : i32
    %c0_i32_0 = arith.constant 0 : i32
    %c0_i32_1 = arith.constant 0 : i32
    return %c0_i32, %c0_i32_0 : i32, i32
  }
  func.func @transform_5(%arg0: i32) -> (i32, i32) {
    %c0_i32 = arith.constant 0 : i32
    %c0_i32_0 = arith.constant 0 : i32
    %c0_i32_1 = arith.constant 0 : i32
    return %c0_i32, %c0_i32_0 : i32, i32
  }
  func.func @transform_6(%arg0: i32) -> (i32, i32) {
    %c0_i32 = arith.constant 0 : i32
    %c0_i32_0 = arith.constant 0 : i32
    %c0_i32_1 = arith.constant 0 : i32
    return %c0_i32, %c0_i32_0 : i32, i32
  }
  func.func @transform_7(%arg0: i32) -> (i32, i32) {
    %c0_i32 = arith.constant 0 : i32
    %c0_i32_0 = arith.constant 0 : i32
    %c0_i32_1 = arith.constant 0 : i32
    return %c0_i32, %c0_i32_0 : i32, i32
  }
  func.func @transform_8(%arg0: i32) -> (i32, i32) {
    %c0_i32 = arith.constant 0 : i32
    %c0_i32_0 = arith.constant 0 : i32
    %c0_i32_1 = arith.constant 0 : i32
    return %c0_i32, %c0_i32_0 : i32, i32
  }
  func.func @transform_9(%arg0: i32) -> (i32, i32) {
    %c0_i32 = arith.constant 0 : i32
    %c0_i32_0 = arith.constant 0 : i32
    %c0_i32_1 = arith.constant 0 : i32
    return %c0_i32, %c0_i32_0 : i32, i32
  }
  func.func @transform_10(%arg0: i32) -> (i32, i32) {
    %c0_i32 = arith.constant 0 : i32
    %c0_i32_0 = arith.constant 0 : i32
    %c0_i32_1 = arith.constant 0 : i32
    return %c0_i32, %c0_i32_0 : i32, i32
  }
  func.func @transform_11(%arg0: i32) -> (i32, i32) {
    %c0_i32 = arith.constant 0 : i32
    %c0_i32_0 = arith.constant 0 : i32
    %c0_i32_1 = arith.constant 0 : i32
    return %c0_i32, %c0_i32_0 : i32, i32
  }
  func.func @transform_12(%arg0: i32) -> (i32, i32) {
    %c0_i32 = arith.constant 0 : i32
    %c0_i32_0 = arith.constant 0 : i32
    %c0_i32_1 = arith.constant 0 : i32
    return %c0_i32, %c0_i32_0 : i32, i32
  }
  func.func @transform_13(%arg0: i32) -> (i32, i32) {
    %c0_i32 = arith.constant 0 : i32
    %c0_i32_0 = arith.constant 0 : i32
    %c0_i32_1 = arith.constant 0 : i32
    return %c0_i32, %c0_i32_0 : i32, i32
  }
  func.func @transform_14(%arg0: i32) -> (i32, i32) {
    %c0_i32 = arith.constant 0 : i32
    %c0_i32_0 = arith.constant 0 : i32
    return %arg0, %c0_i32 : i32, i32
  }
}

module attributes {stable_mosaic.version = 11 : i64} {
  func.func @_qkv_kernel(%arg0: i32, %arg1: memref<8x256xf32, #tpu.memory_space<vmem>>, %arg2: memref<1x256xf32, #tpu.memory_space<vmem>>, %arg3: memref<1x256xf32, #tpu.memory_space<vmem>>, %arg4: memref<256x256xbf16, #tpu.memory_space<vmem>>, %arg5: memref<1x256xf32, #tpu.memory_space<vmem>>, %arg6: memref<256x256xbf16, #tpu.memory_space<vmem>>, %arg7: memref<1x256xf32, #tpu.memory_space<vmem>>, %arg8: memref<256x256xbf16, #tpu.memory_space<vmem>>, %arg9: memref<1x256xf32, #tpu.memory_space<vmem>>, %arg10: memref<8x256xbf16, #tpu.memory_space<vmem>>, %arg11: memref<8x256xbf16, #tpu.memory_space<vmem>>, %arg12: memref<8x256xbf16, #tpu.memory_space<vmem>>) attributes {dimension_semantics = [#tpu.dimension_semantics<parallel>], iteration_bounds = array<i64: 1>, scalar_prefetch = 0 : i64, scratch_operands = 0 : i64, tpu.core_type = #tpu.core_type<tc>, window_params = [{transform_indices = @transform_0, window_bounds = array<i64: 8, 256>}, {pipeline_mode = #tpu.pipeline_mode<synchronous>, transform_indices = @transform_1, window_bounds = array<i64: 1, 256>}, {pipeline_mode = #tpu.pipeline_mode<synchronous>, transform_indices = @transform_2, window_bounds = array<i64: 1, 256>}, {pipeline_mode = #tpu.pipeline_mode<synchronous>, transform_indices = @transform_3, window_bounds = array<i64: 256, 256>}, {pipeline_mode = #tpu.pipeline_mode<synchronous>, transform_indices = @transform_4, window_bounds = array<i64: 1, 256>}, {pipeline_mode = #tpu.pipeline_mode<synchronous>, transform_indices = @transform_5, window_bounds = array<i64: 256, 256>}, {pipeline_mode = #tpu.pipeline_mode<synchronous>, transform_indices = @transform_6, window_bounds = array<i64: 1, 256>}, {pipeline_mode = #tpu.pipeline_mode<synchronous>, transform_indices = @transform_7, window_bounds = array<i64: 256, 256>}, {pipeline_mode = #tpu.pipeline_mode<synchronous>, transform_indices = @transform_8, window_bounds = array<i64: 1, 256>}, {transform_indices = @transform_9, window_bounds = array<i64: 8, 256>}, {transform_indices = @transform_10, window_bounds = array<i64: 8, 256>}, {transform_indices = @transform_11, window_bounds = array<i64: 8, 256>}]} {
    %c0 = arith.constant 0 : index
    %c0_0 = arith.constant 0 : index
    %0 = vector.load %arg1[%c0, %c0_0] : memref<8x256xf32, #tpu.memory_space<vmem>>, vector<8x256xf32>
    %c0_1 = arith.constant 0 : index
    %c0_2 = arith.constant 0 : index
    %1 = vector.load %arg2[%c0_1, %c0_2] : memref<1x256xf32, #tpu.memory_space<vmem>>, vector<1x256xf32>
    %c0_3 = arith.constant 0 : index
    %c0_4 = arith.constant 0 : index
    %2 = vector.load %arg3[%c0_3, %c0_4] : memref<1x256xf32, #tpu.memory_space<vmem>>, vector<1x256xf32>
    %cst = arith.constant dense<0.000000e+00> : vector<8xf32>
    %3 = vector.multi_reduction <add>, %0, %cst [1] : vector<8x256xf32> to vector<8xf32>
    %4 = vector.shape_cast %3 : vector<8xf32> to vector<8x1xf32>
    %cst_5 = arith.constant 2.560000e+02 : f32
    %5 = vector.broadcast %cst_5 : f32 to vector<8x1xf32>
    %6 = arith.divf %4, %5 : vector<8x1xf32>
    %7 = vector.broadcast %6 : vector<8x1xf32> to vector<8x256xf32>
    %8 = arith.subf %0, %7 : vector<8x256xf32>
    %9 = arith.mulf %8, %8 : vector<8x256xf32>
    %cst_6 = arith.constant dense<0.000000e+00> : vector<8xf32>
    %10 = vector.multi_reduction <add>, %9, %cst_6 [1] : vector<8x256xf32> to vector<8xf32>
    %11 = vector.shape_cast %10 : vector<8xf32> to vector<8x1xf32>
    %cst_7 = arith.constant 2.560000e+02 : f32
    %12 = vector.broadcast %cst_7 : f32 to vector<8x1xf32>
    %13 = arith.divf %11, %12 : vector<8x1xf32>
    %14 = vector.broadcast %6 : vector<8x1xf32> to vector<8x256xf32>
    %15 = arith.subf %0, %14 : vector<8x256xf32>
    %cst_8 = arith.constant 9.99999996E-13 : f32
    %16 = vector.broadcast %cst_8 : f32 to vector<8x1xf32>
    %17 = arith.addf %13, %16 : vector<8x1xf32>
    %18 = math.rsqrt %17 : vector<8x1xf32>
    %19 = vector.broadcast %18 : vector<8x1xf32> to vector<8x256xf32>
    %20 = arith.mulf %15, %19 : vector<8x256xf32>
    %21 = vector.broadcast %1 : vector<1x256xf32> to vector<8x256xf32>
    %22 = arith.mulf %20, %21 : vector<8x256xf32>
    %23 = vector.broadcast %2 : vector<1x256xf32> to vector<8x256xf32>
    %24 = arith.addf %22, %23 : vector<8x256xf32>
    %25 = arith.truncf %24 : vector<8x256xf32> to vector<8x256xbf16>
    %c0_9 = arith.constant 0 : index
    %c0_10 = arith.constant 0 : index
    %26 = vector.load %arg4[%c0_9, %c0_10] : memref<256x256xbf16, #tpu.memory_space<vmem>>, vector<256x256xbf16>
    %cst_11 = arith.constant dense<0.000000e+00> : vector<8x256xf32>
    %27 = tpu.matmul %25, %26, %cst_11 {dimension_numbers = #tpu.dot_dimension_numbers<[1], [0], [0], [1], [0, 0, 1, 1], [], []>} : vector<8x256xbf16>, vector<256x256xbf16>, vector<8x256xf32> -> vector<8x256xf32>
    %c0_12 = arith.constant 0 : index
    %c0_13 = arith.constant 0 : index
    %28 = vector.load %arg5[%c0_12, %c0_13] : memref<1x256xf32, #tpu.memory_space<vmem>>, vector<1x256xf32>
    %29 = vector.broadcast %28 : vector<1x256xf32> to vector<8x256xf32>
    %30 = arith.addf %27, %29 : vector<8x256xf32>
    %c0_14 = arith.constant 0 : index
    %c0_15 = arith.constant 0 : index
    %31 = vector.load %arg6[%c0_14, %c0_15] : memref<256x256xbf16, #tpu.memory_space<vmem>>, vector<256x256xbf16>
    %cst_16 = arith.constant dense<0.000000e+00> : vector<8x256xf32>
    %32 = tpu.matmul %25, %31, %cst_16 {dimension_numbers = #tpu.dot_dimension_numbers<[1], [0], [0], [1], [0, 0, 1, 1], [], []>} : vector<8x256xbf16>, vector<256x256xbf16>, vector<8x256xf32> -> vector<8x256xf32>
    %c0_17 = arith.constant 0 : index
    %c0_18 = arith.constant 0 : index
    %33 = vector.load %arg7[%c0_17, %c0_18] : memref<1x256xf32, #tpu.memory_space<vmem>>, vector<1x256xf32>
    %34 = vector.broadcast %33 : vector<1x256xf32> to vector<8x256xf32>
    %35 = arith.addf %32, %34 : vector<8x256xf32>
    %c0_19 = arith.constant 0 : index
    %c0_20 = arith.constant 0 : index
    %36 = vector.load %arg8[%c0_19, %c0_20] : memref<256x256xbf16, #tpu.memory_space<vmem>>, vector<256x256xbf16>
    %cst_21 = arith.constant dense<0.000000e+00> : vector<8x256xf32>
    %37 = tpu.matmul %25, %36, %cst_21 {dimension_numbers = #tpu.dot_dimension_numbers<[1], [0], [0], [1], [0, 0, 1, 1], [], []>} : vector<8x256xbf16>, vector<256x256xbf16>, vector<8x256xf32> -> vector<8x256xf32>
    %c0_22 = arith.constant 0 : index
    %c0_23 = arith.constant 0 : index
    %38 = vector.load %arg9[%c0_22, %c0_23] : memref<1x256xf32, #tpu.memory_space<vmem>>, vector<1x256xf32>
    %39 = vector.broadcast %38 : vector<1x256xf32> to vector<8x256xf32>
    %40 = arith.addf %37, %39 : vector<8x256xf32>
    %cst_24 = arith.constant 0.0883883461 : f32
    %41 = vector.broadcast %cst_24 : f32 to vector<8x256xf32>
    %42 = arith.mulf %30, %41 : vector<8x256xf32>
    %43 = arith.truncf %42 : vector<8x256xf32> to vector<8x256xbf16>
    %c0_25 = arith.constant 0 : index
    %c0_26 = arith.constant 0 : index
    %44 = vector.load %arg10[%c0_25, %c0_26] : memref<8x256xbf16, #tpu.memory_space<vmem>>, vector<8x256xbf16>
    tpu.vector_store %arg10[%c0_25, %c0_26], %43 {strides = array<i32>} : memref<8x256xbf16, #tpu.memory_space<vmem>>, vector<8x256xbf16>,
    %45 = arith.truncf %35 : vector<8x256xf32> to vector<8x256xbf16>
    %c0_27 = arith.constant 0 : index
    %c0_28 = arith.constant 0 : index
    %46 = vector.load %arg11[%c0_27, %c0_28] : memref<8x256xbf16, #tpu.memory_space<vmem>>, vector<8x256xbf16>
    tpu.vector_store %arg11[%c0_27, %c0_28], %45 {strides = array<i32>} : memref<8x256xbf16, #tpu.memory_space<vmem>>, vector<8x256xbf16>,
    %47 = arith.truncf %40 : vector<8x256xf32> to vector<8x256xbf16>
    %c0_29 = arith.constant 0 : index
    %c0_30 = arith.constant 0 : index
    %48 = vector.load %arg12[%c0_29, %c0_30] : memref<8x256xbf16, #tpu.memory_space<vmem>>, vector<8x256xbf16>
    tpu.vector_store %arg12[%c0_29, %c0_30], %47 {strides = array<i32>} : memref<8x256xbf16, #tpu.memory_space<vmem>>, vector<8x256xbf16>,
    return
  }
  func.func @transform_0(%arg0: i32) -> (i32, i32) {
    %c0_i32 = arith.constant 0 : i32
    %c0_i32_0 = arith.constant 0 : i32
    return %arg0, %c0_i32 : i32, i32
  }
  func.func @transform_1(%arg0: i32) -> (i32, i32) {
    %c0_i32 = arith.constant 0 : i32
    %c0_i32_0 = arith.constant 0 : i32
    %c0_i32_1 = arith.constant 0 : i32
    return %c0_i32, %c0_i32_0 : i32, i32
  }
  func.func @transform_2(%arg0: i32) -> (i32, i32) {
    %c0_i32 = arith.constant 0 : i32
    %c0_i32_0 = arith.constant 0 : i32
    %c0_i32_1 = arith.constant 0 : i32
    return %c0_i32, %c0_i32_0 : i32, i32
  }
  func.func @transform_3(%arg0: i32) -> (i32, i32) {
    %c0_i32 = arith.constant 0 : i32
    %c0_i32_0 = arith.constant 0 : i32
    %c0_i32_1 = arith.constant 0 : i32
    return %c0_i32, %c0_i32_0 : i32, i32
  }
  func.func @transform_4(%arg0: i32) -> (i32, i32) {
    %c0_i32 = arith.constant 0 : i32
    %c0_i32_0 = arith.constant 0 : i32
    %c0_i32_1 = arith.constant 0 : i32
    return %c0_i32, %c0_i32_0 : i32, i32
  }
  func.func @transform_5(%arg0: i32) -> (i32, i32) {
    %c0_i32 = arith.constant 0 : i32
    %c0_i32_0 = arith.constant 0 : i32
    %c0_i32_1 = arith.constant 0 : i32
    return %c0_i32, %c0_i32_0 : i32, i32
  }
  func.func @transform_6(%arg0: i32) -> (i32, i32) {
    %c0_i32 = arith.constant 0 : i32
    %c0_i32_0 = arith.constant 0 : i32
    %c0_i32_1 = arith.constant 0 : i32
    return %c0_i32, %c0_i32_0 : i32, i32
  }
  func.func @transform_7(%arg0: i32) -> (i32, i32) {
    %c0_i32 = arith.constant 0 : i32
    %c0_i32_0 = arith.constant 0 : i32
    %c0_i32_1 = arith.constant 0 : i32
    return %c0_i32, %c0_i32_0 : i32, i32
  }
  func.func @transform_8(%arg0: i32) -> (i32, i32) {
    %c0_i32 = arith.constant 0 : i32
    %c0_i32_0 = arith.constant 0 : i32
    %c0_i32_1 = arith.constant 0 : i32
    return %c0_i32, %c0_i32_0 : i32, i32
  }
  func.func @transform_9(%arg0: i32) -> (i32, i32) {
    %c0_i32 = arith.constant 0 : i32
    %c0_i32_0 = arith.constant 0 : i32
    return %arg0, %c0_i32 : i32, i32
  }
  func.func @transform_10(%arg0: i32) -> (i32, i32) {
    %c0_i32 = arith.constant 0 : i32
    %c0_i32_0 = arith.constant 0 : i32
    return %arg0, %c0_i32 : i32, i32
  }
  func.func @transform_11(%arg0: i32) -> (i32, i32) {
    %c0_i32 = arith.constant 0 : i32
    %c0_i32_0 = arith.constant 0 : i32
    return %arg0, %c0_i32 : i32, i32
  }
}

module attributes {stable_mosaic.version = 11 : i64} {
  func.func @_variance_kernel(%arg0: i32, %arg1: memref<8x256xf32, #tpu.memory_space<vmem>>, %arg2: memref<768x128xbf16, #tpu.memory_space<vmem>>, %arg3: memref<1x128xf32, #tpu.memory_space<vmem>>, %arg4: memref<1x128xf32, #tpu.memory_space<vmem>>, %arg5: memref<1x128xf32, #tpu.memory_space<vmem>>, %arg6: memref<384x128xbf16, #tpu.memory_space<vmem>>, %arg7: memref<1x128xf32, #tpu.memory_space<vmem>>, %arg8: memref<1x128xf32, #tpu.memory_space<vmem>>, %arg9: memref<1x128xf32, #tpu.memory_space<vmem>>, %arg10: memref<128x128xbf16, #tpu.memory_space<vmem>>, %arg11: memref<1x128xf32, #tpu.memory_space<vmem>>, %arg12: memref<8x128xf32, #tpu.memory_space<vmem>>) attributes {dimension_semantics = [#tpu.dimension_semantics<arbitrary>], iteration_bounds = array<i64: 1>, scalar_prefetch = 0 : i64, scratch_operands = 0 : i64, tpu.core_type = #tpu.core_type<tc>, window_params = [{pipeline_mode = #tpu.pipeline_mode<synchronous>, transform_indices = @transform_0, window_bounds = array<i64: 8, 256>}, {pipeline_mode = #tpu.pipeline_mode<synchronous>, transform_indices = @transform_1, window_bounds = array<i64: 768, 128>}, {pipeline_mode = #tpu.pipeline_mode<synchronous>, transform_indices = @transform_2, window_bounds = array<i64: 1, 128>}, {pipeline_mode = #tpu.pipeline_mode<synchronous>, transform_indices = @transform_3, window_bounds = array<i64: 1, 128>}, {pipeline_mode = #tpu.pipeline_mode<synchronous>, transform_indices = @transform_4, window_bounds = array<i64: 1, 128>}, {pipeline_mode = #tpu.pipeline_mode<synchronous>, transform_indices = @transform_5, window_bounds = array<i64: 384, 128>}, {pipeline_mode = #tpu.pipeline_mode<synchronous>, transform_indices = @transform_6, window_bounds = array<i64: 1, 128>}, {pipeline_mode = #tpu.pipeline_mode<synchronous>, transform_indices = @transform_7, window_bounds = array<i64: 1, 128>}, {pipeline_mode = #tpu.pipeline_mode<synchronous>, transform_indices = @transform_8, window_bounds = array<i64: 1, 128>}, {pipeline_mode = #tpu.pipeline_mode<synchronous>, transform_indices = @transform_9, window_bounds = array<i64: 128, 128>}, {pipeline_mode = #tpu.pipeline_mode<synchronous>, transform_indices = @transform_10, window_bounds = array<i64: 1, 128>}, {pipeline_mode = #tpu.pipeline_mode<synchronous>, transform_indices = @transform_11, window_bounds = array<i64: 8, 128>}]} {
    %c0 = arith.constant 0 : index
    %c0_0 = arith.constant 0 : index
    %0 = vector.load %arg1[%c0, %c0_0] : memref<8x256xf32, #tpu.memory_space<vmem>>, vector<8x256xf32>
    %1 = tpu.iota {dimensions = array<i32: 0>} : vector<8x256xi32>
    %c1_i32 = arith.constant 1 : i32
    %2 = tpu.dynamic_rotate %0 by %c1_i32 dim 0 : vector<8x256xf32>, i32 -> vector<8x256xf32>
    %c-1_i32 = arith.constant -1 : i32
    %3 = vector.broadcast %c-1_i32 : i32 to vector<8x256xi32>
    %4 = arith.addi %1, %3 : vector<8x256xi32>
    %c0_i32 = arith.constant 0 : i32
    %5 = vector.broadcast %c0_i32 : i32 to vector<8x256xi32>
    %6 = arith.cmpi sge, %4, %5 : vector<8x256xi32>
    %c-1_i32_1 = arith.constant -1 : i32
    %7 = vector.broadcast %c-1_i32_1 : i32 to vector<8x256xi32>
    %8 = arith.addi %1, %7 : vector<8x256xi32>
    %c8_i32 = arith.constant 8 : i32
    %9 = vector.broadcast %c8_i32 : i32 to vector<8x256xi32>
    %10 = arith.cmpi slt, %8, %9 : vector<8x256xi32>
    %11 = arith.andi %6, %10 : vector<8x256xi1>
    %cst = arith.constant 0.000000e+00 : f32
    %12 = vector.broadcast %cst : f32 to vector<8x256xf32>
    %13 = arith.select %11, %2, %12 : vector<8x256xi1>, vector<8x256xf32>
    %c7_i32 = arith.constant 7 : i32
    %14 = tpu.dynamic_rotate %0 by %c7_i32 dim 0 : vector<8x256xf32>, i32 -> vector<8x256xf32>
    %c1_i32_2 = arith.constant 1 : i32
    %15 = vector.broadcast %c1_i32_2 : i32 to vector<8x256xi32>
    %16 = arith.addi %1, %15 : vector<8x256xi32>
    %c0_i32_3 = arith.constant 0 : i32
    %17 = vector.broadcast %c0_i32_3 : i32 to vector<8x256xi32>
    %18 = arith.cmpi sge, %16, %17 : vector<8x256xi32>
    %c1_i32_4 = arith.constant 1 : i32
    %19 = vector.broadcast %c1_i32_4 : i32 to vector<8x256xi32>
    %20 = arith.addi %1, %19 : vector<8x256xi32>
    %c8_i32_5 = arith.constant 8 : i32
    %21 = vector.broadcast %c8_i32_5 : i32 to vector<8x256xi32>
    %22 = arith.cmpi slt, %20, %21 : vector<8x256xi32>
    %23 = arith.andi %18, %22 : vector<8x256xi1>
    %cst_6 = arith.constant 0.000000e+00 : f32
    %24 = vector.broadcast %cst_6 : f32 to vector<8x256xf32>
    %25 = arith.select %23, %14, %24 : vector<8x256xi1>, vector<8x256xf32>
    %26 = tpu.concatenate %13, %0, %25 in 1 : vector<8x256xf32>, vector<8x256xf32>, vector<8x256xf32> -> vector<8x768xf32>
    %27 = arith.truncf %26 : vector<8x768xf32> to vector<8x768xbf16>
    %c0_7 = arith.constant 0 : index
    %c0_8 = arith.constant 0 : index
    %28 = vector.load %arg2[%c0_7, %c0_8] : memref<768x128xbf16, #tpu.memory_space<vmem>>, vector<768x128xbf16>
    %cst_9 = arith.constant dense<0.000000e+00> : vector<8x128xf32>
    %29 = tpu.matmul %27, %28, %cst_9 {dimension_numbers = #tpu.dot_dimension_numbers<[1], [0], [0], [1], [0, 0, 1, 1], [], []>} : vector<8x768xbf16>, vector<768x128xbf16>, vector<8x128xf32> -> vector<8x128xf32>
    %c0_10 = arith.constant 0 : index
    %c0_11 = arith.constant 0 : index
    %30 = vector.load %arg3[%c0_10, %c0_11] : memref<1x128xf32, #tpu.memory_space<vmem>>, vector<1x128xf32>
    %31 = vector.broadcast %30 : vector<1x128xf32> to vector<8x128xf32>
    %32 = arith.addf %29, %31 : vector<8x128xf32>
    %cst_12 = arith.constant 0.000000e+00 : f32
    %33 = vector.broadcast %cst_12 : f32 to vector<8x128xf32>
    %34 = arith.maximumf %32, %33 : vector<8x128xf32>
    %c0_13 = arith.constant 0 : index
    %c0_14 = arith.constant 0 : index
    %35 = vector.load %arg4[%c0_13, %c0_14] : memref<1x128xf32, #tpu.memory_space<vmem>>, vector<1x128xf32>
    %c0_15 = arith.constant 0 : index
    %c0_16 = arith.constant 0 : index
    %36 = vector.load %arg5[%c0_15, %c0_16] : memref<1x128xf32, #tpu.memory_space<vmem>>, vector<1x128xf32>
    %cst_17 = arith.constant dense<0.000000e+00> : vector<8xf32>
    %37 = vector.multi_reduction <add>, %34, %cst_17 [1] : vector<8x128xf32> to vector<8xf32>
    %38 = vector.shape_cast %37 : vector<8xf32> to vector<8x1xf32>
    %cst_18 = arith.constant 1.280000e+02 : f32
    %39 = vector.broadcast %cst_18 : f32 to vector<8x1xf32>
    %40 = arith.divf %38, %39 : vector<8x1xf32>
    %41 = vector.broadcast %40 : vector<8x1xf32> to vector<8x128xf32>
    %42 = arith.subf %34, %41 : vector<8x128xf32>
    %43 = arith.mulf %42, %42 : vector<8x128xf32>
    %cst_19 = arith.constant dense<0.000000e+00> : vector<8xf32>
    %44 = vector.multi_reduction <add>, %43, %cst_19 [1] : vector<8x128xf32> to vector<8xf32>
    %45 = vector.shape_cast %44 : vector<8xf32> to vector<8x1xf32>
    %cst_20 = arith.constant 1.280000e+02 : f32
    %46 = vector.broadcast %cst_20 : f32 to vector<8x1xf32>
    %47 = arith.divf %45, %46 : vector<8x1xf32>
    %48 = vector.broadcast %40 : vector<8x1xf32> to vector<8x128xf32>
    %49 = arith.subf %34, %48 : vector<8x128xf32>
    %cst_21 = arith.constant 9.99999996E-13 : f32
    %50 = vector.broadcast %cst_21 : f32 to vector<8x1xf32>
    %51 = arith.addf %47, %50 : vector<8x1xf32>
    %52 = math.rsqrt %51 : vector<8x1xf32>
    %53 = vector.broadcast %52 : vector<8x1xf32> to vector<8x128xf32>
    %54 = arith.mulf %49, %53 : vector<8x128xf32>
    %55 = vector.broadcast %35 : vector<1x128xf32> to vector<8x128xf32>
    %56 = arith.mulf %54, %55 : vector<8x128xf32>
    %57 = vector.broadcast %36 : vector<1x128xf32> to vector<8x128xf32>
    %58 = arith.addf %56, %57 : vector<8x128xf32>
    %59 = tpu.iota {dimensions = array<i32: 0>} : vector<8x128xi32>
    %c1_i32_22 = arith.constant 1 : i32
    %60 = tpu.dynamic_rotate %58 by %c1_i32_22 dim 0 : vector<8x128xf32>, i32 -> vector<8x128xf32>
    %c-1_i32_23 = arith.constant -1 : i32
    %61 = vector.broadcast %c-1_i32_23 : i32 to vector<8x128xi32>
    %62 = arith.addi %59, %61 : vector<8x128xi32>
    %c0_i32_24 = arith.constant 0 : i32
    %63 = vector.broadcast %c0_i32_24 : i32 to vector<8x128xi32>
    %64 = arith.cmpi sge, %62, %63 : vector<8x128xi32>
    %c-1_i32_25 = arith.constant -1 : i32
    %65 = vector.broadcast %c-1_i32_25 : i32 to vector<8x128xi32>
    %66 = arith.addi %59, %65 : vector<8x128xi32>
    %c8_i32_26 = arith.constant 8 : i32
    %67 = vector.broadcast %c8_i32_26 : i32 to vector<8x128xi32>
    %68 = arith.cmpi slt, %66, %67 : vector<8x128xi32>
    %69 = arith.andi %64, %68 : vector<8x128xi1>
    %cst_27 = arith.constant 0.000000e+00 : f32
    %70 = vector.broadcast %cst_27 : f32 to vector<8x128xf32>
    %71 = arith.select %69, %60, %70 : vector<8x128xi1>, vector<8x128xf32>
    %c7_i32_28 = arith.constant 7 : i32
    %72 = tpu.dynamic_rotate %58 by %c7_i32_28 dim 0 : vector<8x128xf32>, i32 -> vector<8x128xf32>
    %c1_i32_29 = arith.constant 1 : i32
    %73 = vector.broadcast %c1_i32_29 : i32 to vector<8x128xi32>
    %74 = arith.addi %59, %73 : vector<8x128xi32>
    %c0_i32_30 = arith.constant 0 : i32
    %75 = vector.broadcast %c0_i32_30 : i32 to vector<8x128xi32>
    %76 = arith.cmpi sge, %74, %75 : vector<8x128xi32>
    %c1_i32_31 = arith.constant 1 : i32
    %77 = vector.broadcast %c1_i32_31 : i32 to vector<8x128xi32>
    %78 = arith.addi %59, %77 : vector<8x128xi32>
    %c8_i32_32 = arith.constant 8 : i32
    %79 = vector.broadcast %c8_i32_32 : i32 to vector<8x128xi32>
    %80 = arith.cmpi slt, %78, %79 : vector<8x128xi32>
    %81 = arith.andi %76, %80 : vector<8x128xi1>
    %cst_33 = arith.constant 0.000000e+00 : f32
    %82 = vector.broadcast %cst_33 : f32 to vector<8x128xf32>
    %83 = arith.select %81, %72, %82 : vector<8x128xi1>, vector<8x128xf32>
    %84 = tpu.concatenate %71, %58, %83 in 1 : vector<8x128xf32>, vector<8x128xf32>, vector<8x128xf32> -> vector<8x384xf32>
    %85 = arith.truncf %84 : vector<8x384xf32> to vector<8x384xbf16>
    %c0_34 = arith.constant 0 : index
    %c0_35 = arith.constant 0 : index
    %86 = vector.load %arg6[%c0_34, %c0_35] : memref<384x128xbf16, #tpu.memory_space<vmem>>, vector<384x128xbf16>
    %cst_36 = arith.constant dense<0.000000e+00> : vector<8x128xf32>
    %87 = tpu.matmul %85, %86, %cst_36 {dimension_numbers = #tpu.dot_dimension_numbers<[1], [0], [0], [1], [0, 0, 1, 1], [], []>} : vector<8x384xbf16>, vector<384x128xbf16>, vector<8x128xf32> -> vector<8x128xf32>
    %c0_37 = arith.constant 0 : index
    %c0_38 = arith.constant 0 : index
    %88 = vector.load %arg7[%c0_37, %c0_38] : memref<1x128xf32, #tpu.memory_space<vmem>>, vector<1x128xf32>
    %89 = vector.broadcast %88 : vector<1x128xf32> to vector<8x128xf32>
    %90 = arith.addf %87, %89 : vector<8x128xf32>
    %cst_39 = arith.constant 0.000000e+00 : f32
    %91 = vector.broadcast %cst_39 : f32 to vector<8x128xf32>
    %92 = arith.maximumf %90, %91 : vector<8x128xf32>
    %c0_40 = arith.constant 0 : index
    %c0_41 = arith.constant 0 : index
    %93 = vector.load %arg8[%c0_40, %c0_41] : memref<1x128xf32, #tpu.memory_space<vmem>>, vector<1x128xf32>
    %c0_42 = arith.constant 0 : index
    %c0_43 = arith.constant 0 : index
    %94 = vector.load %arg9[%c0_42, %c0_43] : memref<1x128xf32, #tpu.memory_space<vmem>>, vector<1x128xf32>
    %cst_44 = arith.constant dense<0.000000e+00> : vector<8xf32>
    %95 = vector.multi_reduction <add>, %92, %cst_44 [1] : vector<8x128xf32> to vector<8xf32>
    %96 = vector.shape_cast %95 : vector<8xf32> to vector<8x1xf32>
    %cst_45 = arith.constant 1.280000e+02 : f32
    %97 = vector.broadcast %cst_45 : f32 to vector<8x1xf32>
    %98 = arith.divf %96, %97 : vector<8x1xf32>
    %99 = vector.broadcast %98 : vector<8x1xf32> to vector<8x128xf32>
    %100 = arith.subf %92, %99 : vector<8x128xf32>
    %101 = arith.mulf %100, %100 : vector<8x128xf32>
    %cst_46 = arith.constant dense<0.000000e+00> : vector<8xf32>
    %102 = vector.multi_reduction <add>, %101, %cst_46 [1] : vector<8x128xf32> to vector<8xf32>
    %103 = vector.shape_cast %102 : vector<8xf32> to vector<8x1xf32>
    %cst_47 = arith.constant 1.280000e+02 : f32
    %104 = vector.broadcast %cst_47 : f32 to vector<8x1xf32>
    %105 = arith.divf %103, %104 : vector<8x1xf32>
    %106 = vector.broadcast %98 : vector<8x1xf32> to vector<8x128xf32>
    %107 = arith.subf %92, %106 : vector<8x128xf32>
    %cst_48 = arith.constant 9.99999996E-13 : f32
    %108 = vector.broadcast %cst_48 : f32 to vector<8x1xf32>
    %109 = arith.addf %105, %108 : vector<8x1xf32>
    %110 = math.rsqrt %109 : vector<8x1xf32>
    %111 = vector.broadcast %110 : vector<8x1xf32> to vector<8x128xf32>
    %112 = arith.mulf %107, %111 : vector<8x128xf32>
    %113 = vector.broadcast %93 : vector<1x128xf32> to vector<8x128xf32>
    %114 = arith.mulf %112, %113 : vector<8x128xf32>
    %115 = vector.broadcast %94 : vector<1x128xf32> to vector<8x128xf32>
    %116 = arith.addf %114, %115 : vector<8x128xf32>
    %117 = arith.truncf %116 : vector<8x128xf32> to vector<8x128xbf16>
    %c0_49 = arith.constant 0 : index
    %c0_50 = arith.constant 0 : index
    %118 = vector.load %arg10[%c0_49, %c0_50] : memref<128x128xbf16, #tpu.memory_space<vmem>>, vector<128x128xbf16>
    %cst_51 = arith.constant dense<0.000000e+00> : vector<8x128xf32>
    %119 = tpu.matmul %117, %118, %cst_51 {dimension_numbers = #tpu.dot_dimension_numbers<[1], [0], [0], [1], [0, 0, 1, 1], [], []>} : vector<8x128xbf16>, vector<128x128xbf16>, vector<8x128xf32> -> vector<8x128xf32>
    %c0_52 = arith.constant 0 : index
    %c0_53 = arith.constant 0 : index
    %120 = vector.load %arg11[%c0_52, %c0_53] : memref<1x128xf32, #tpu.memory_space<vmem>>, vector<1x128xf32>
    %121 = vector.broadcast %120 : vector<1x128xf32> to vector<8x128xf32>
    %122 = arith.addf %119, %121 : vector<8x128xf32>
    %c0_54 = arith.constant 0 : index
    %c0_55 = arith.constant 0 : index
    %123 = vector.load %arg12[%c0_54, %c0_55] : memref<8x128xf32, #tpu.memory_space<vmem>>, vector<8x128xf32>
    tpu.vector_store %arg12[%c0_54, %c0_55], %122 {strides = array<i32>} : memref<8x128xf32, #tpu.memory_space<vmem>>, vector<8x128xf32>,
    return
  }
  func.func @transform_0(%arg0: i32) -> (i32, i32) {
    %c0_i32 = arith.constant 0 : i32
    %c0_i32_0 = arith.constant 0 : i32
    %c0_i32_1 = arith.constant 0 : i32
    return %c0_i32, %c0_i32_0 : i32, i32
  }
  func.func @transform_1(%arg0: i32) -> (i32, i32) {
    %c0_i32 = arith.constant 0 : i32
    %c0_i32_0 = arith.constant 0 : i32
    %c0_i32_1 = arith.constant 0 : i32
    return %c0_i32, %c0_i32_0 : i32, i32
  }
  func.func @transform_2(%arg0: i32) -> (i32, i32) {
    %c0_i32 = arith.constant 0 : i32
    %c0_i32_0 = arith.constant 0 : i32
    %c0_i32_1 = arith.constant 0 : i32
    return %c0_i32, %c0_i32_0 : i32, i32
  }
  func.func @transform_3(%arg0: i32) -> (i32, i32) {
    %c0_i32 = arith.constant 0 : i32
    %c0_i32_0 = arith.constant 0 : i32
    %c0_i32_1 = arith.constant 0 : i32
    return %c0_i32, %c0_i32_0 : i32, i32
  }
  func.func @transform_4(%arg0: i32) -> (i32, i32) {
    %c0_i32 = arith.constant 0 : i32
    %c0_i32_0 = arith.constant 0 : i32
    %c0_i32_1 = arith.constant 0 : i32
    return %c0_i32, %c0_i32_0 : i32, i32
  }
  func.func @transform_5(%arg0: i32) -> (i32, i32) {
    %c0_i32 = arith.constant 0 : i32
    %c0_i32_0 = arith.constant 0 : i32
    %c0_i32_1 = arith.constant 0 : i32
    return %c0_i32, %c0_i32_0 : i32, i32
  }
  func.func @transform_6(%arg0: i32) -> (i32, i32) {
    %c0_i32 = arith.constant 0 : i32
    %c0_i32_0 = arith.constant 0 : i32
    %c0_i32_1 = arith.constant 0 : i32
    return %c0_i32, %c0_i32_0 : i32, i32
  }
  func.func @transform_7(%arg0: i32) -> (i32, i32) {
    %c0_i32 = arith.constant 0 : i32
    %c0_i32_0 = arith.constant 0 : i32
    %c0_i32_1 = arith.constant 0 : i32
    return %c0_i32, %c0_i32_0 : i32, i32
  }
  func.func @transform_8(%arg0: i32) -> (i32, i32) {
    %c0_i32 = arith.constant 0 : i32
    %c0_i32_0 = arith.constant 0 : i32
    %c0_i32_1 = arith.constant 0 : i32
    return %c0_i32, %c0_i32_0 : i32, i32
  }
  func.func @transform_9(%arg0: i32) -> (i32, i32) {
    %c0_i32 = arith.constant 0 : i32
    %c0_i32_0 = arith.constant 0 : i32
    %c0_i32_1 = arith.constant 0 : i32
    return %c0_i32, %c0_i32_0 : i32, i32
  }
  func.func @transform_10(%arg0: i32) -> (i32, i32) {
    %c0_i32 = arith.constant 0 : i32
    %c0_i32_0 = arith.constant 0 : i32
    %c0_i32_1 = arith.constant 0 : i32
    return %c0_i32, %c0_i32_0 : i32, i32
  }
  func.func @transform_11(%arg0: i32) -> (i32, i32) {
    %c0_i32 = arith.constant 0 : i32
    %c0_i32_0 = arith.constant 0 : i32
    %c0_i32_1 = arith.constant 0 : i32
    return %c0_i32, %c0_i32_0 : i32, i32
  }
}

</mosaic_0001>

<bundles_post_ra>
// kernel: _encoder_half.3
= control target key start
LH: loop header
LB: loop body
LE: loop exit
PB: predicated region body
PF: predicated region fallthrough
CT: control target
= control target key end

     0   :  { %17 = vsyncpa [#allocation3], 0  ;;  %s1361_s0 = inlined_call_operand.vmem [shape: f32[8,256], index: 0, kind: input, shape index: {}]   ;;  %s1362_s1 = inlined_call_operand.vmem [shape: f32[1,256], index: 1, kind: input, shape index: {}]   ;;  %s1363_s2 = inlined_call_operand.vmem [shape: f32[1,256], index: 2, kind: input, shape index: {}]   ;;  %s1364_s3 = inlined_call_operand.hbm [shape: bf16[256,256], index: 3, kind: input, shape index: {}]   ;;  %s1365_s4 = inlined_call_operand.vmem [shape: f32[1,256], index: 4, kind: input, shape index: {}]   ;;  %s1366_s5 = inlined_call_operand.hbm [shape: bf16[256,256], index: 5, kind: input, shape index: {}]   ;;  %s1367_s6 = inlined_call_operand.vmem [shape: f32[1,256], index: 6, kind: input, shape index: {}]   ;;  %s1368_s7 = inlined_call_operand.hbm [shape: bf16[256,256], index: 7, kind: input, shape index: {}]   ;;  %s1369_s8 = inlined_call_operand.vmem [shape: f32[1,256], index: 8, kind: input, shape index: {}]   ;;  %s1370_s9 = inlined_call_operand.vmem [shape: bf16[8,256], index: 9, kind: output, shape index: {0}]   ;;  %s1371_s10 = inlined_call_operand.vmem [shape: bf16[8,256], index: 10, kind: output, shape index: {1}]   ;;  %s1372_s11 = inlined_call_operand.vmem [shape: bf16[8,256], index: 11, kind: output, shape index: {2}]  }
   0x1   :  { %18 = vsyncpa [#allocation5], 0  ;;  %s1220_s17 = smov [#allocation4]   ;;  %s1221_s19 = smov [#allocation2]  }
   0x2   :  { %s44_s18 = sshll.u32 %s1220_s17, 4  ;;  %s30_s20 = sshll.u32 %s1221_s19, 4  ;;  %s45_s18 = int_to_ptr.vmem [resolvable:$true] %s44_s18  ;;  %s31_s20 = int_to_ptr.vmem [resolvable:$true] %s30_s20 }
   0x3   :  { %s1164_s21 = scalar_lea.vmem %s45_s18, 4096  ;;  %p1169_p1 = scmp.lt.s32.totalorder %s45_s18, %s45_s18 }
   0x4   :  { %p1165_p0 = scmp.ne.s32.totalorder %s45_s18, %s1164_s21  ;;  %p1170_p2 = scmp.lt.s32.totalorder %s1164_s21, %s1164_s21 }
   0x6   :  { %p1171_p3 = por %p1170_p2, %p1169_p1 }
   0x8   :  { %p1172_p4 = pnand %p1171_p3, %p1165_p0 }
   0xa   :  { %1175 = shalt.err (!%p1172_p4)
}
   0xb   :  { %s1222_s22 = smov 128   ;;  %s1223_s23 = smov 8  }
   0xc   :  { %50 = dma.hbm_to_vmem [thread:$0]  %s1366_s5, 4096, %s45_s18, [#allocation5], %s1222_s22, %s1222_s22, %s1223_s23  }
   0xd   :  { %s1184_s26 = scalar_lea.vmem %s31_s20, 4096  ;;  %p1189_p6 = scmp.lt.s32.totalorder %s31_s20, %s31_s20 }
   0xe   :  { %p1185_p5 = scmp.ne.s32.totalorder %s31_s20, %s1184_s26  ;;  %p1190_p7 = scmp.lt.s32.totalorder %s1184_s26, %s1184_s26 }
  0x10   :  { %p1191_p8 = por %p1190_p7, %p1189_p6 }
  0x12   :  { %p1192_p9 = pnand %p1191_p8, %p1185_p5 }
  0x14   :  { %1195 = shalt.err (!%p1192_p9)
}
  0x15   :  { %36 = dma.hbm_to_vmem [thread:$0]  %s1364_s3, 4096, %s31_s20, [#allocation3], %s1222_s22, %s1222_s22, %s1223_s23  }
  0x16   :  { %s1224_s29 = smov [#allocation6]  }
  0x17   :  { %s58_s30 = sshll.u32 %s1224_s29, 4  ;;  %s59_s30 = int_to_ptr.vmem [resolvable:$true] %s58_s30 }
  0x18   :  { %s1204_s12 = scalar_lea.vmem %s59_s30, 4096  ;;  %p1209_p11 = scmp.lt.s32.totalorder %s59_s30, %s59_s30 }
  0x19   :  { %p1205_p10 = scmp.ne.s32.totalorder %s59_s30, %s1204_s12  ;;  %p1210_p12 = scmp.lt.s32.totalorder %s1204_s12, %s1204_s12 }
  0x1b   :  { %p1211_p13 = por %p1210_p12, %p1209_p11 }
  0x1d   :  { %p1212_p0 = pnand %p1211_p13, %p1205_p10 }
  0x1f   :  { %1215 = shalt.err (!%p1212_p0)
}
  0x20   :  { %64 = dma.hbm_to_vmem [thread:$0]  %s1368_s7, 4096, %s59_s30, [#allocation5], %s1222_s22, %s1222_s22, %s1223_s23  }
  0x21   :  { %1216 = dma.done.wait [#allocation3], 4096  }
  0x22   :  { %1217 = vsyncadd [#allocation3], 4294963200 }
  0x23   :  { %1218 = dma.done.wait [#allocation5], 8192  }
  0x24   :  { %1219 = vsyncadd [#allocation5], 4294959104  ;;  %v1297_v0 = vld [vmem:[%s1361_s0] sm:$0xff]  ;;  %v1302_v1 = vld [vmem:[%s1361_s0 + $0x8] sm:$0xff] }
  0x25   :  { %v80_v2 = vadd.f32 %v1302_v1, %v1297_v0  ;;  %v1010_v3 = vld [vmem:[#allocation2 + $0x74] ss:$8 sps:$4 sm:$0xff]   ;;  %v1012_v4 = vld [vmem:[#allocation2 + $0x70] ss:$8 sps:$4 sm:$0xff]   ;;  %v1016_v7 = vld [vmem:[#allocation2 + $0x64] ss:$8 sps:$4 sm:$0xff]  }
  0x26   :  { %v1013_v5 = vld [vmem:[#allocation4 + $0x74] ss:$8 sps:$4 sm:$0xff]   ;;  %v1015_v6 = vld [vmem:[#allocation4 + $0x70] ss:$8 sps:$4 sm:$0xff]   ;;  %329 = vmatprep.subr.bf16.mxu0 %v1010_v3  ;;  %v1019_v8 = vld [vmem:[#allocation4 + $0x64] ss:$8 sps:$4 sm:$0xff]  }
  0x27   :  { %81 = vadd.xlane.f32.xlu0 %v80_v2  ;;  %574 = vmatprep.subr.bf16.mxu1 %v1013_v5  ;;  %v1018_v9 = vld [vmem:[#allocation2 + $0x60] ss:$8 sps:$4 sm:$0xff]   ;;  %v1022_v11 = vld [vmem:[#allocation2 + $0x54] ss:$8 sps:$4 sm:$0xff]   ;;  %v1024_v13 = vld [vmem:[#allocation2 + $0x50] ss:$8 sps:$4 sm:$0xff]  }
  0x28   :  { %330 = vmatpush1.bf16.msra.mxu0 %v1012_v4  ;;  %575 = vmatpush1.bf16.msra.mxu1 %v1015_v6  ;;  %v1021_v10 = vld [vmem:[#allocation4 + $0x60] ss:$8 sps:$4 sm:$0xff]   ;;  %v1025_v12 = vld [vmem:[#allocation4 + $0x54] ss:$8 sps:$4 sm:$0xff]   ;;  %v1027_v14 = vld [vmem:[#allocation4 + $0x50] ss:$8 sps:$4 sm:$0xff]  }
  0x29   :  { %331 = vmatprep.subr.bf16.mxu0 %v1016_v7  ;;  %576 = vmatprep.subr.bf16.mxu1 %v1019_v8  ;;  %v1028_v15 = vld [vmem:[#allocation2 + $0x44] ss:$8 sps:$4 sm:$0xff]   ;;  %v1030_v17 = vld [vmem:[#allocation2 + $0x40] ss:$8 sps:$4 sm:$0xff]   ;;  %v1034_v19 = vld [vmem:[#allocation2 + $0x34] ss:$8 sps:$4 sm:$0xff]  }
  0x2a   :  { %v1031_v16 = vld [vmem:[#allocation4 + $0x44] ss:$8 sps:$4 sm:$0xff]   ;;  %v1033_v18 = vld [vmem:[#allocation4 + $0x40] ss:$8 sps:$4 sm:$0xff]   ;;  %v1037_v20 = vld [vmem:[#allocation4 + $0x34] ss:$8 sps:$4 sm:$0xff]  }
  0x2b   :  { %v1036_v21 = vld [vmem:[#allocation2 + $0x30] ss:$8 sps:$4 sm:$0xff]   ;;  %v1040_v23 = vld [vmem:[#allocation2 + $0x24] ss:$8 sps:$4 sm:$0xff]   ;;  %v1042_v25 = vld [vmem:[#allocation2 + $0x20] ss:$8 sps:$4 sm:$0xff]  }
  0x2c   :  { %332 = vmatpush1.bf16.msra.mxu0 %v1018_v9  ;;  %577 = vmatpush1.bf16.msra.mxu1 %v1021_v10  ;;  %v1039_v22 = vld [vmem:[#allocation4 + $0x30] ss:$8 sps:$4 sm:$0xff]   ;;  %v1043_v24 = vld [vmem:[#allocation4 + $0x24] ss:$8 sps:$4 sm:$0xff]   ;;  %v1045_v26 = vld [vmem:[#allocation4 + $0x20] ss:$8 sps:$4 sm:$0xff]  }
  0x2d   :  { %333 = vmatprep.subr.bf16.mxu0 %v1022_v11  ;;  %578 = vmatprep.subr.bf16.mxu1 %v1025_v12  ;;  %v1046_v27 = vld [vmem:[#allocation2 + $0x14] ss:$8 sps:$4 sm:$0xff]   ;;  %v1048_v29 = vld [vmem:[#allocation2 + $0x10] ss:$8 sps:$4 sm:$0xff]   ;;  %v1052_v31 = vld [vmem:[#allocation2 + $0x4] ss:$8 sps:$4 sm:$0xff]  }
  0x2e   :  { %v1049_v28 = vld [vmem:[#allocation4 + $0x14] ss:$8 sps:$4 sm:$0xff]   ;;  %v1051_v30 = vld [vmem:[#allocation4 + $0x10] ss:$8 sps:$4 sm:$0xff]   ;;  %v1055_v32 = vld [vmem:[#allocation4 + $0x4] ss:$8 sps:$4 sm:$0xff]  }
  0x2f   :  { %v1054_v33 = vld [vmem:[#allocation2] ss:$8 sps:$4 sm:$0xff]   ;;  %v1058_v35 = vld [vmem:[#allocation2 + $0xf4] ss:$8 sps:$4 sm:$0xff]   ;;  %v1060_v37 = vld [vmem:[#allocation2 + $0xf0] ss:$8 sps:$4 sm:$0xff]  }
  0x30   :  { %334 = vmatpush1.bf16.msra.mxu0 %v1024_v13  ;;  %579 = vmatpush1.bf16.msra.mxu1 %v1027_v14  ;;  %v1057_v34 = vld [vmem:[#allocation4] ss:$8 sps:$4 sm:$0xff]   ;;  %v1061_v36 = vld [vmem:[#allocation4 + $0xf4] ss:$8 sps:$4 sm:$0xff]   ;;  %v1063_v38 = vld [vmem:[#allocation4 + $0xf0] ss:$8 sps:$4 sm:$0xff]   ;;  %v98_v14 = vlaneseq }
  0x31   :  { %335 = vmatprep.subr.bf16.mxu0 %v1028_v15  ;;  %580 = vmatprep.subr.bf16.mxu1 %v1031_v16  ;;  %v1064_v39 = vld [vmem:[#allocation2 + $0xe4] ss:$8 sps:$4 sm:$0xff]   ;;  %v1066_v41 = vld [vmem:[#allocation2 + $0xe0] ss:$8 sps:$4 sm:$0xff]   ;;  %v1070_v50 = vld [vmem:[#allocation2 + $0xd4] ss:$8 sps:$4 sm:$0xff]  }
  0x32   :  { %v1067_v40 = vld [vmem:[#allocation4 + $0xe4] ss:$8 sps:$4 sm:$0xff]   ;;  %v1069_v49 = vld [vmem:[#allocation4 + $0xe0] ss:$8 sps:$4 sm:$0xff]   ;;  %v1072_v51 = vld [vmem:[#allocation2 + $0xd0] ss:$8 sps:$4 sm:$0xff]  }
  0x33   :  { %v1073_v52 = vld [vmem:[#allocation4 + $0xd4] ss:$8 sps:$4 sm:$0xff]   ;;  %v1075_v53 = vld [vmem:[#allocation4 + $0xd0] ss:$8 sps:$4 sm:$0xff]   ;;  %v1076_v54 = vld [vmem:[#allocation2 + $0xc4] ss:$8 sps:$4 sm:$0xff]  }
  0x34   :  { %336 = vmatpush1.bf16.msra.mxu0 %v1030_v17  ;;  %581 = vmatpush1.bf16.msra.mxu1 %v1033_v18  ;;  %v1078_v55 = vld [vmem:[#allocation2 + $0xc0] ss:$8 sps:$4 sm:$0xff]   ;;  %v1079_v56 = vld [vmem:[#allocation4 + $0xc4] ss:$8 sps:$4 sm:$0xff]   ;;  %v1082_v58 = vld [vmem:[#allocation2 + $0xb4] ss:$8 sps:$4 sm:$0xff]  }
  0x35   :  { %337 = vmatprep.subr.bf16.mxu0 %v1034_v19  ;;  %582 = vmatprep.subr.bf16.mxu1 %v1037_v20  ;;  %v1081_v57 = vld [vmem:[#allocation4 + $0xc0] ss:$8 sps:$4 sm:$0xff]   ;;  %v1085_v59 = vld [vmem:[#allocation4 + $0xb4] ss:$8 sps:$4 sm:$0xff]   ;;  %v1084_v60 = vld [vmem:[#allocation2 + $0xb0] ss:$8 sps:$4 sm:$0xff]  }
  0x36   :  { %v1087_v61 = vld [vmem:[#allocation4 + $0xb0] ss:$8 sps:$4 sm:$0xff]   ;;  %v1088_v62 = vld [vmem:[#allocation2 + $0xa4] ss:$8 sps:$4 sm:$0xff]   ;;  %v1094_v2 = vld [vmem:[#allocation2 + $0x94] ss:$8 sps:$4 sm:$0xff]  }
  0x37   :  { %v1091_v63 = vld [vmem:[#allocation4 + $0xa4] ss:$8 sps:$4 sm:$0xff]   ;;  %v1097_v3 = vld [vmem:[#allocation4 + $0x94] ss:$8 sps:$4 sm:$0xff]   ;;  %v1096_v4 = vld [vmem:[#allocation2 + $0x90] ss:$8 sps:$4 sm:$0xff]  }
  0x38   :  { %338 = vmatpush1.bf16.msra.mxu0 %v1036_v21  ;;  %583 = vmatpush1.bf16.msra.mxu1 %v1039_v22  ;;  %v1099_v5 = vld [vmem:[#allocation4 + $0x90] ss:$8 sps:$4 sm:$0xff]   ;;  %v1100_v6 = vld [vmem:[#allocation2 + $0x84] ss:$8 sps:$4 sm:$0xff]   ;;  %v1102_v8 = vld [vmem:[#allocation2 + $0x80] ss:$8 sps:$4 sm:$0xff]  }
  0x39   :  { %339 = vmatprep.subr.bf16.mxu0 %v1040_v23  ;;  %584 = vmatprep.subr.bf16.mxu1 %v1043_v24  ;;  %v1103_v7 = vld [vmem:[#allocation4 + $0x84] ss:$8 sps:$4 sm:$0xff]   ;;  %v1105_v9 = vld [vmem:[#allocation4 + $0x80] ss:$8 sps:$4 sm:$0xff]   ;;  %v1108_v10 = vld [vmem:[#allocation6 + $0x74] ss:$8 sps:$4 sm:$0xff]  }
  0x3a   :  { %v99_v15 = vshrl.u32 %v98_v14, 7  ;;  %v78_v18 = vld [vmem:[%s1362_s1] sm:$0x3] }
  0x3b   :  { %v79_v19 = vld [vmem:[%s1363_s2] sm:$0x3] }
  0x3c   :  { %340 = vmatpush1.bf16.msra.mxu0 %v1042_v25  ;;  %585 = vmatpush1.bf16.msra.mxu1 %v1045_v26  ;;  %v1316_v16 = vsub.s32 1, %v99_v15  ;;  %v1318_v17 = vsub.s32 0, %v99_v15 }
  0x3d   :  { %341 = vmatprep.subr.bf16.mxu0 %v1046_v27  ;;  %586 = vmatprep.subr.bf16.mxu1 %v1049_v28 }
  0x3e   :  { %v105_v20 = vrot.slane %v78_v18, %v1316_v16  ;;  %v101_v21 = vrot.slane %v78_v18, %v1318_v17  ;;  %v118_v24 = vrot.slane %v79_v19, %v1316_v16  ;;  %v114_v26 = vrot.slane %v79_v19, %v1318_v17 }
  0x40   :  { %342 = vmatpush1.bf16.msra.mxu0 %v1048_v29  ;;  %587 = vmatpush1.bf16.msra.mxu1 %v1051_v30 }
  0x41   :  { %343 = vmatprep.subr.bf16.mxu0 %v1052_v31  ;;  %588 = vmatprep.subr.bf16.mxu1 %v1055_v32  ;;  %v1106_v32 = vld [vmem:[#allocation6 + $0x70] ss:$8 sps:$4 sm:$0xff]  }
  0x44   :  { %344 = vmatpush1.bf16.msra.mxu0 %v1054_v33  ;;  %589 = vmatpush1.bf16.msra.mxu1 %v1057_v34  ;;  %v1111_v34 = vld [vmem:[#allocation6 + $0x64] ss:$8 sps:$4 sm:$0xff]  }
  0x45   :  { %345 = vmatprep.subr.bf16.mxu0 %v1058_v35  ;;  %590 = vmatprep.subr.bf16.mxu1 %v1061_v36  ;;  %v1109_v35 = vld [vmem:[#allocation6 + $0x60] ss:$8 sps:$4 sm:$0xff]   ;;  %v1114_v36 = vld [vmem:[#allocation6 + $0x54] ss:$8 sps:$4 sm:$0xff]  }
  0x48   :  { %346 = vmatpush2.bf16.msra.mxu0 %v1060_v37  ;;  %591 = vmatpush2.bf16.msra.mxu1 %v1063_v38  ;;  %v1112_v37 = vld [vmem:[#allocation6 + $0x50] ss:$8 sps:$4 sm:$0xff]   ;;  %v1117_v38 = vld [vmem:[#allocation6 + $0x44] ss:$8 sps:$4 sm:$0xff]  }
  0x49   :  { %347 = vmatprep.subr.bf16.mxu0 %v1064_v39  ;;  %592 = vmatprep.subr.bf16.mxu1 %v1067_v40  ;;  %v1115_v39 = vld [vmem:[#allocation6 + $0x40] ss:$8 sps:$4 sm:$0xff]   ;;  %v1120_v40 = vld [vmem:[#allocation6 + $0x34] ss:$8 sps:$4 sm:$0xff]  }
  0x4c   :  { %348 = vmatpush2.bf16.msra.mxu0 %v1066_v41  ;;  %593 = vmatpush2.bf16.msra.mxu1 %v1069_v49  ;;  %v1118_v41 = vld [vmem:[#allocation6 + $0x30] ss:$8 sps:$4 sm:$0xff]  }
  0x4d   :  { %349 = vmatprep.subr.bf16.mxu0 %v1070_v50  ;;  %594 = vmatprep.subr.bf16.mxu1 %v1073_v52  ;;  %v1130_v49 = vld [vmem:[#allocation6 + $0xf0] ss:$8 sps:$4 sm:$0xff]   ;;  %v1135_v50 = vld [vmem:[#allocation6 + $0xe4] ss:$8 sps:$4 sm:$0xff]   ;;  %v1138_v52 = vld [vmem:[#allocation6 + $0xd4] ss:$8 sps:$4 sm:$0xff]  }
  0x50   :  { %350 = vmatpush2.bf16.msra.mxu0 %v1072_v51  ;;  %595 = vmatpush2.bf16.msra.mxu1 %v1075_v53  ;;  %v1133_v51 = vld [vmem:[#allocation6 + $0xe0] ss:$8 sps:$4 sm:$0xff]   ;;  %v1136_v53 = vld [vmem:[#allocation6 + $0xd0] ss:$8 sps:$4 sm:$0xff]  }
  0x51   :  { %351 = vmatprep.subr.bf16.mxu0 %v1076_v54  ;;  %596 = vmatprep.subr.bf16.mxu1 %v1079_v56  ;;  %v1141_v54 = vld [vmem:[#allocation6 + $0xc4] ss:$8 sps:$4 sm:$0xff]   ;;  %v1144_v56 = vld [vmem:[#allocation6 + $0xb4] ss:$8 sps:$4 sm:$0xff]  }
  0x54   :  { %352 = vmatpush2.bf16.msra.mxu0 %v1078_v55  ;;  %597 = vmatpush2.bf16.msra.mxu1 %v1081_v57  ;;  %v1139_v55 = vld [vmem:[#allocation6 + $0xc0] ss:$8 sps:$4 sm:$0xff]   ;;  %v1142_v57 = vld [vmem:[#allocation6 + $0xb0] ss:$8 sps:$4 sm:$0xff]  }
  0x55   :  { %353 = vmatprep.subr.bf16.mxu0 %v1082_v58  ;;  %598 = vmatprep.subr.bf16.mxu1 %v1085_v59  ;;  %v1147_v58 = vld [vmem:[#allocation6 + $0xa4] ss:$8 sps:$4 sm:$0xff]   ;;  %v1145_v59 = vld [vmem:[#allocation6 + $0xa0] ss:$8 sps:$4 sm:$0xff]  }
  0x58   :  { %354 = vmatpush2.bf16.msra.mxu0 %v1084_v60  ;;  %599 = vmatpush2.bf16.msra.mxu1 %v1087_v61  ;;  %v1150_v60 = vld [vmem:[#allocation6 + $0x94] ss:$8 sps:$4 sm:$0xff]   ;;  %v1148_v61 = vld [vmem:[#allocation6 + $0x90] ss:$8 sps:$4 sm:$0xff]  }
  0x59   :  { %355 = vmatprep.subr.bf16.mxu0 %v1088_v62  ;;  %600 = vmatprep.subr.bf16.mxu1 %v1091_v63  ;;  %v1153_v62 = vld [vmem:[#allocation6 + $0x84] ss:$8 sps:$4 sm:$0xff]   ;;  %v1151_v63 = vld [vmem:[#allocation6 + $0x80] ss:$8 sps:$4 sm:$0xff]  }
  0xb0   :  { %v82_v42 = vpop.xlane.xlu0 %81 }
  0xb1   :  { %v84_v43 = vmul.f32 0.00390625, %v82_v42  ;;  %v1123_v42 = vld [vmem:[#allocation6 + $0x24] ss:$8 sps:$4 sm:$0xff]  }
  0xb3   :  { %v1307_v44 = vsub.f32 %v1297_v0, %v84_v43  ;;  %v1310_v45 = vsub.f32 %v1302_v1, %v84_v43  ;;  %v1090_v0 = vld [vmem:[#allocation2 + $0xa0] ss:$8 sps:$4 sm:$0xff]  }
  0xb4   :  { %v1093_v1 = vld [vmem:[#allocation4 + $0xa0] ss:$8 sps:$4 sm:$0xff]   ;;  %356 = vmatpush2.bf16.msra.mxu0 %v1090_v0 }
  0xb5   :  { %v87_v46 = vmul.f32 %v1307_v44, %v1307_v44  ;;  %v88_v47 = vmul.f32 %v1310_v45, %v1310_v45  ;;  %601 = vmatpush2.bf16.msra.mxu1 %v1093_v1  ;;  %357 = vmatprep.subr.bf16.mxu0 %v1094_v2  ;;  %v1121_v43 = vld [vmem:[#allocation6 + $0x20] ss:$8 sps:$4 sm:$0xff]  }
  0xb6   :  { %602 = vmatprep.subr.bf16.mxu1 %v1097_v3  ;;  %v157_v0 = vld [vmem:[%s1365_s4] sm:$0x3] }
  0xb7   :  { %v89_v48 = vadd.f32 %v88_v47, %v87_v46  ;;  %v1129_v46 = vld [vmem:[#allocation6 + $0x4] ss:$8 sps:$4 sm:$0xff]   ;;  %v1127_v47 = vld [vmem:[#allocation6] ss:$8 sps:$4 sm:$0xff]   ;;  %v162_v2 = vrot.slane %v157_v0, %v1318_v17 }
  0xb8   :  { %358 = vmatpush2.bf16.msra.mxu0 %v1096_v4  ;;  %v402_v1 = vld [vmem:[%s1367_s6] sm:$0x3]  ;;  %v166_v4 = vrot.slane %v157_v0, %v1316_v16 }
  0xb9   :  { %90 = vadd.xlane.f32.xlu0 %v89_v48  ;;  %603 = vmatpush2.bf16.msra.mxu1 %v1099_v5  ;;  %v1132_v48 = vld [vmem:[#allocation6 + $0xf4] ss:$8 sps:$4 sm:$0xff]   ;;  %v407_v3 = vrot.slane %v402_v1, %v1318_v17  ;;  %v411_v5 = vrot.slane %v402_v1, %v1316_v16 }
  0xba   :  { %359 = vmatprep.subr.bf16.mxu0 %v1100_v6  ;;  %604 = vmatprep.subr.bf16.mxu1 %v1103_v7 }
  0xbc   :  { %360 = vmatpush2.bf16.msra.mxu0 %v1102_v8 }
  0xbd   :  { %605 = vmatpush2.bf16.msra.mxu1 %v1105_v9  ;;  %819 = vmatprep.subr.bf16.mxu0 %v1108_v10 }
 0x142   :  { %v91_v11 = vpop.xlane.xlu0 %90 }
 0x143   :  { %v92_v12 = vmul.f32 0.00390625, %v91_v11 }
 0x145   :  { %v93_v13 = vadd.f32 1e-12, %v92_v12 }
 0x147   :  { %1154 = vrsqrt.f32 %v93_v13 }
 0x154   :  { %v1155_v22 = vpop.eup %1154 }
 0x155   :  { %v96_v23 = vmul.f32 %v1155_v22, %v1310_v45  ;;  %v95_v25 = vmul.f32 %v1155_v22, %v1307_v44  ;;  %v1126_v44 = vld [vmem:[#allocation6 + $0x14] ss:$8 sps:$4 sm:$0xff]   ;;  %v1124_v45 = vld [vmem:[#allocation6 + $0x10] ss:$8 sps:$4 sm:$0xff]  }
 0x157   :  { %v109_v27 = vmul.f32 %v105_v20, %v96_v23  ;;  %v108_v28 = vmul.f32 %v101_v21, %v95_v25 }
 0x159   :  { %v122_v29 = vadd.f32 %v118_v24, %v109_v27  ;;  %v121_v30 = vadd.f32 %v114_v26, %v108_v28  ;;  %v647_v24 = vld [vmem:[%s1369_s8] sm:$0x3] }
 0x15a   :  { %v652_v25 = vrot.slane %v647_v24, %v1318_v17  ;;  %v656_v26 = vrot.slane %v647_v24, %v1316_v16 }
 0x15b   :  { %v124_v31 = vpack.c.bf16 %v122_v29, %v122_v29  ;;  %v1332_v33 = vpack.c.bf16 %v121_v30, %v121_v30 }
 0x15d   :  { %361 = vmatprep.mubr.bf16.mxu0 %v124_v31  ;;  %606 = vmatprep.mubr.bf16.mxu1 %v124_v31 }
 0x15e   :  { %362 = vmatmul.mubr.bf16.vlgmr.msra.gmra.mxu0 %v1332_v33  ;;  %607 = vmatmul.mubr.bf16.vlgmr.msra.gmra.mxu1 %v1332_v33 }
 0x15f   :  { %820 = vmatpush1.bf16.msra.mxu0 %v1106_v32  ;;  %851 = vmatprep.mubr.bf16.mxu0 %v124_v31 }
 0x160   :  { %821 = vmatprep.subr.bf16.mxu0 %v1111_v34 }
 0x163   :  { %822 = vmatpush1.bf16.msra.mxu0 %v1109_v35 }
 0x164   :  { %823 = vmatprep.subr.bf16.mxu0 %v1114_v36 }
 0x167   :  { %824 = vmatpush1.bf16.msra.mxu0 %v1112_v37 }
 0x168   :  { %825 = vmatprep.subr.bf16.mxu0 %v1117_v38 }
 0x16b   :  { %826 = vmatpush1.bf16.msra.mxu0 %v1115_v39 }
 0x16c   :  { %827 = vmatprep.subr.bf16.mxu0 %v1120_v40 }
 0x16f   :  { %828 = vmatpush1.bf16.msra.mxu0 %v1118_v41 }
 0x170   :  { %829 = vmatprep.subr.bf16.mxu0 %v1123_v42 }
 0x173   :  { %830 = vmatpush1.bf16.msra.mxu0 %v1121_v43 }
 0x174   :  { %831 = vmatprep.subr.bf16.mxu0 %v1126_v44 }
 0x177   :  { %832 = vmatpush1.bf16.msra.mxu0 %v1124_v45 }
 0x178   :  { %833 = vmatprep.subr.bf16.mxu0 %v1129_v46 }
 0x17b   :  { %834 = vmatpush1.bf16.msra.mxu0 %v1127_v47 }
 0x17c   :  { %835 = vmatprep.subr.bf16.mxu0 %v1132_v48 }
 0x17f   :  { %836 = vmatpush2.bf16.msra.mxu0 %v1130_v49 }
 0x180   :  { %837 = vmatprep.subr.bf16.mxu0 %v1135_v50 }
 0x183   :  { %838 = vmatpush2.bf16.msra.mxu0 %v1133_v51 }
 0x184   :  { %839 = vmatprep.subr.bf16.mxu0 %v1138_v52 }
 0x187   :  { %840 = vmatpush2.bf16.msra.mxu0 %v1136_v53 }
 0x188   :  { %841 = vmatprep.subr.bf16.mxu0 %v1141_v54 }
 0x18b   :  { %842 = vmatpush2.bf16.msra.mxu0 %v1139_v55 }
 0x18c   :  { %843 = vmatprep.subr.bf16.mxu0 %v1144_v56 }
 0x18f   :  { %844 = vmatpush2.bf16.msra.mxu0 %v1142_v57 }
 0x190   :  { %845 = vmatprep.subr.bf16.mxu0 %v1147_v58 }
 0x193   :  { %846 = vmatpush2.bf16.msra.mxu0 %v1145_v59 }
 0x194   :  { %847 = vmatprep.subr.bf16.mxu0 %v1150_v60 }
 0x197   :  { %848 = vmatpush2.bf16.msra.mxu0 %v1148_v61 }
 0x198   :  { %849 = vmatprep.subr.bf16.mxu0 %v1153_v62 }
 0x19b   :  { %850 = vmatpush2.bf16.msra.mxu0 %v1151_v63 }
 0x19e   :  { %852 = vmatmul.mubr.bf16.vlgmr.msra.gmra.mxu0 %v1332_v33 }
 0x21e   :  { %v363_v6 = vpop.f32.mrf.mxu0  ;;  %v608_v7 = vpop.f32.mrf.mxu1 }
 0x21f   :  { %v364_v8 = vadd.f32 %v363_v6, %v162_v2  ;;  %v609_v11 = vadd.f32 %v608_v7, %v407_v3 }
 0x220   :  { %v365_v9 = vpop.f32.mrf.mxu0  ;;  %v610_v10 = vpop.f32.mrf.mxu1 }
 0x221   :  { %v366_v12 = vadd.f32 %v365_v9, %v166_v4  ;;  %v611_v13 = vadd.f32 %v610_v10, %v411_v5  ;;  %v860_v18 = vmul.f32 0.088388346, %v364_v8 }
 0x222   :  { %v367_v14 = vpop.f32.mrf.mxu0  ;;  %v612_v15 = vpop.f32.mrf.mxu1 }
 0x223   :  { %v861_v19 = vmul.f32 0.088388346, %v366_v12  ;;  %v1003_v20 = vpack.c.bf16 %v611_v13, %v609_v11 }
 0x224   :  { %v368_v21 = vpop.f32.mrf.mxu0  ;;  %v613_v22 = vpop.f32.mrf.mxu1 }
 0x225   :  { %v1002_v23 = vpack.c.bf16 %v861_v19, %v860_v18  ;;  %879 = vst [vmem:[%s1371_s10] sm:$0xff] %v1003_v20 }
 0x227   :  { %870 = vst [vmem:[%s1370_s9] sm:$0xff] %v1002_v23 }
 0x25e   :  { %v853_v27 = vpop.f32.mrf.mxu0 }
 0x25f   :  { %v854_v29 = vadd.f32 %v853_v27, %v652_v25 }
 0x260   :  { %v855_v28 = vpop.f32.mrf.mxu0 }
 0x261   :  { %v856_v30 = vadd.f32 %v855_v28, %v656_v26 }
 0x262   :  { %v857_v31 = vpop.f32.mrf.mxu0 }
 0x263   :  { %v1004_v32 = vpack.c.bf16 %v856_v30, %v854_v29 }
 0x264   :  { %v858_v33 = vpop.f32.mrf.mxu0 }
 0x265   :  { %888 = vst [vmem:[%s1372_s11] sm:$0xff] %v1004_v32 }
 0x266   :  { %901 = vsyncpa [#allocation3], 1 }
 0x267   :  { %902 = vsyncpa [#allocation5], 1 }

// kernel: _encoder_half.4
= control target key start
LH: loop header
LB: loop body
LE: loop exit
PB: predicated region body
PF: predicated region fallthrough
CT: control target
= control target key end

     0   :  { %v1442_v0 = vmov 0.0   ;;  %vm1443_vm0 = vmmov 0   ;;  %vm125_vm1 = vcmask 64512   ;;  %vm141_vm2 = vcmask 1043456   ;;  %s1902_s2 = inlined_call_operand.vmem [shape: bf16[8,256], index: 2, kind: input, shape index: {}]   ;;  %s1903_s1 = inlined_call_operand.vmem [shape: bf16[8,256], index: 1, kind: input, shape index: {}]   ;;  %s1904_s3 = inlined_call_operand.vmem [shape: bf16[8,256], index: 3, kind: input, shape index: {}]   ;;  %s1905_s4 = inlined_call_operand.vmem [shape: bf16[256,256], index: 4, kind: input, shape index: {}]   ;;  %s1906_s0 = inlined_call_operand.vmem [shape: f32[8,256], index: 0, kind: input, shape index: {}]   ;;  %s1907_s5 = inlined_call_operand.vmem [shape: f32[1,256], index: 5, kind: input, shape index: {}]   ;;  %s1908_s8 = inlined_call_operand.vmem [shape: bf16[256,256], index: 8, kind: input, shape index: {}]   ;;  %s1909_s10 = inlined_call_operand.vmem [shape: bf16[256,256], index: 10, kind: input, shape index: {}]   ;;  %s1910_s6 = inlined_call_operand.vmem [shape: f32[1,256], index: 6, kind: input, shape index: {}]   ;;  %s1911_s7 = inlined_call_operand.vmem [shape: f32[1,256], index: 7, kind: input, shape index: {}]   ;;  %s1912_s9 = inlined_call_operand.vmem [shape: f32[1,256], index: 9, kind: input, shape index: {}]   ;;  %s1913_s11 = inlined_call_operand.vmem [shape: f32[1,256], index: 11, kind: input, shape index: {}]   ;;  %s1914_s12 = inlined_call_operand.vmem [shape: f32[1,256], index: 12, kind: input, shape index: {}]   ;;  %s1915_s13 = inlined_call_operand.vmem [shape: f32[1,256], index: 13, kind: input, shape index: {}]   ;;  %s1916_s14 = inlined_call_operand.vmem [shape: f32[8,256], index: 14, kind: output, shape index: {}]  }
   0x1   :  { %1256 = vmatprep.subr.bf16.mxu0 %v1442_v0  ;;  %v51_v1 = vld [vmem:[%s1902_s2] sm:$0xff]  ;;  %1258 = vmatprep.mubr.msk.bf16.mxu0 %vm1443_vm0, %v1442_v0  ;;  %v1288_v37 = vld [vmem:[%s1905_s4 + $0x74] ss:$8 sps:$4 sm:$0xff]   ;;  %v1444_v38 = vmov 0   ;;  %v1310_v39 = vld [vmem:[%s1905_s4 + $0xf0] ss:$8 sps:$4 sm:$0xff]  }
   0x2   :  { %1257 = vmatpush3.bf16.xpose.msra.mxu0 %v51_v1  ;;  %1262 = vmatprep.subr.bf16.mxu1 %v1442_v0  ;;  %v50_v2 = vld [vmem:[%s1903_s1] sm:$0xff]  ;;  %v1149_v20 = vcombine.high %v51_v1, %v51_v1  ;;  %v1312_v40 = vld [vmem:[%s1905_s4 + $0xf4] ss:$8 sps:$4 sm:$0xff]   ;;  %v1316_v44 = vld [vmem:[%s1905_s4 + $0xd0] ss:$8 sps:$4 sm:$0xff]  }
   0x3   :  { %1264 = vmatprep.mubr.msk.bf16.mxu1 %vm1443_vm0, %v1442_v0  ;;  %1274 = vmatprep.subr.bf16.mxu0 %v1442_v0  ;;  %v52_v13 = vld [vmem:[%s1904_s3] sm:$0xff]  ;;  %v1148_v22 = vcombine.high %v50_v2, %v50_v2  ;;  %v1318_v43 = vld [vmem:[%s1905_s4 + $0xd4] ss:$8 sps:$4 sm:$0xff]   ;;  %v1322_v48 = vld [vmem:[%s1905_s4 + $0xb0] ss:$8 sps:$4 sm:$0xff]  }
   0x4   :  { %v143_v14 = vsel %vm141_vm2, %v52_v13, 0  ;;  %v1150_v15 = vcombine.high %v52_v13, %v52_v13  ;;  %v1315_v41 = vld [vmem:[%s1905_s4 + $0xe4] ss:$8 sps:$4 sm:$0xff]   ;;  %v1313_v42 = vld [vmem:[%s1905_s4 + $0xe0] ss:$8 sps:$4 sm:$0xff]  }
   0x5   :  { %1263 = vmatpush3.bf16.msra.mxu1 %v143_v14  ;;  %v1321_v45 = vld [vmem:[%s1905_s4 + $0xc4] ss:$8 sps:$4 sm:$0xff]   ;;  %v1319_v46 = vld [vmem:[%s1905_s4 + $0xc0] ss:$8 sps:$4 sm:$0xff]   ;;  %v1324_v47 = vld [vmem:[%s1905_s4 + $0xb4] ss:$8 sps:$4 sm:$0xff]  }
   0x6   :  { %v253_v16 = vsel %vm141_vm2, %v1150_v15, 0  ;;  %1268 = vmatprep.subr.bf16.mxu1 %v1442_v0  ;;  %v1327_v49 = vld [vmem:[%s1905_s4 + $0xa4] ss:$8 sps:$4 sm:$0xff]   ;;  %v1325_v50 = vld [vmem:[%s1905_s4 + $0xa0] ss:$8 sps:$4 sm:$0xff]  }
   0x7   :  { %v1330_v51 = vld [vmem:[%s1905_s4 + $0x94] ss:$8 sps:$4 sm:$0xff]   ;;  %v1328_v52 = vld [vmem:[%s1905_s4 + $0x90] ss:$8 sps:$4 sm:$0xff]   ;;  %v1333_v53 = vld [vmem:[%s1905_s4 + $0x84] ss:$8 sps:$4 sm:$0xff]  }
   0x8   :  { %v1331_v54 = vld [vmem:[%s1905_s4 + $0x80] ss:$8 sps:$4 sm:$0xff]   ;;  %v1286_v58 = vld [vmem:[%s1905_s4 + $0x70] ss:$8 sps:$4 sm:$0xff]   ;;  %v1291_v60 = vld [vmem:[%s1905_s4 + $0x64] ss:$8 sps:$4 sm:$0xff]  }
   0x9   :  { %1259 = vmatmul.mubr.bf16.vlgmr.msra.gmra.mxu0 %v50_v2  ;;  %v1289_v61 = vld [vmem:[%s1905_s4 + $0x60] ss:$8 sps:$4 sm:$0xff]   ;;  %v1294_v62 = vld [vmem:[%s1905_s4 + $0x54] ss:$8 sps:$4 sm:$0xff]   ;;  %v1292_v63 = vld [vmem:[%s1905_s4 + $0x50] ss:$8 sps:$4 sm:$0xff]  }
   0xa   :  { %1276 = vmatprep.mubr.msk.bf16.mxu0 %vm1443_vm0, %v1442_v0  ;;  %1275 = vmatpush3.bf16.msra.mxu0 %v253_v16  ;;  %v1295_v1 = vld [vmem:[%s1905_s4 + $0x40] ss:$8 sps:$4 sm:$0xff]   ;;  %v1300_v2 = vld [vmem:[%s1905_s4 + $0x34] ss:$8 sps:$4 sm:$0xff]  }
   0xb   :  { %497 = vmatprep.subr.bf16.mxu0 %v1288_v37 }
  0xc9   :  { %v119_v3 = vpop.f32.mrf.mxu0 }
  0xca   :  { %v126_v4 = vsel %vm125_vm1, %v119_v3, -inf }
  0xcb   :  { %127 = vmax.xlane.f32.xlu0 %v126_v4  ;;  %v1260_v5 = vpop.f32.mrf.mxu0  ;;  %v1303_v4 = vld [vmem:[%s1905_s4 + $0x24] ss:$8 sps:$4 sm:$0xff]  }
  0xcc   :  { %v1301_v5 = vld [vmem:[%s1905_s4 + $0x20] ss:$8 sps:$4 sm:$0xff]  }
  0xcd   :  { %v122_v6 = vpop.f32.mrf.mxu0 }
  0xce   :  { %v1306_v6 = vld [vmem:[%s1905_s4 + $0x14] ss:$8 sps:$4 sm:$0xff]  }
  0xcf   :  { %v1261_v7 = vpop.f32.mrf.mxu0 }
  0xd0   :  { %v1304_v7 = vld [vmem:[%s1905_s4 + $0x10] ss:$8 sps:$4 sm:$0xff]  }
 0x154   :  { %v128_v8 = vpop.xlane.xlu0 %127 }
 0x155   :  { %v129_v9 = vsub.f32 %v119_v3, %v128_v8  ;;  %v1298_v3 = vld [vmem:[%s1905_s4 + $0x30] ss:$8 sps:$4 sm:$0xff]   ;;  %v1309_v8 = vld [vmem:[%s1905_s4 + $0x4] ss:$8 sps:$4 sm:$0xff]  }
 0x157   :  { %v130_v10 = vmul.f32 1.442695, %v129_v9  ;;  %v1307_v9 = vld [vmem:[%s1905_s4] ss:$8 sps:$4 sm:$0xff]  }
 0x159   :  { %1430 = vpow2.f32 %v130_v10 }
 0x166   :  { %v1431_v11 = vpop.eup %1430 }
 0x167   :  { %v132_v12 = vsel %vm125_vm1, %v1431_v11, 0.0 }
 0x168   :  { %133 = vadd.xlane.f32.xlu0 %v132_v12 }
 0x1f1   :  { %v134_v17 = vpop.xlane.xlu0 %133 }
 0x1f2   :  { %1432 = vrcp.f32 %v134_v17 }
 0x1ff   :  { %v1433_v18 = vpop.eup %1432 }
 0x200   :  { %v136_v19 = vmul.f32 %v1433_v18, %v1431_v11 }
 0x202   :  { %v137_v21 = vpack.c.bf16 %v136_v19, %v136_v19 }
 0x204   :  { %1265 = vmatmul.mubr.msk.bf16.vlgmr.msra.gmra.mxu1 %vm125_vm1, %v137_v21 }
 0x205   :  { %1269 = vmatpush3.bf16.xpose.msra.mxu1 %v1149_v20  ;;  %1270 = vmatprep.mubr.msk.bf16.mxu1 %vm1443_vm0, %v1442_v0  ;;  %v1297_v0 = vld [vmem:[%s1905_s4 + $0x44] ss:$8 sps:$4 sm:$0xff]   ;;  %v542_v20 = vlaneseq }
 0x206   :  { %376 = vmatprep.subr.bf16.mxu1 %v1312_v40  ;;  %v1334_v40 = vld [vmem:[%s1908_s8 + $0x70] ss:$8 sps:$4 sm:$0xff]  }
 0x207   :  { %v543_v21 = vshrl.u32 %v542_v20, 7  ;;  %v1388_v20 = vld [vmem:[%s1909_s10 + $0x50] ss:$8 sps:$4 sm:$0xff]  }
 0x20c   :  { %1271 = vmatmul.mubr.bf16.vlgmr.msra.gmra.mxu1 %v1148_v22  ;;  %v1639_v22 = vsub.s32 0, %v543_v21 }
 0x20d   :  { %408 = vmatprep.mubr.bf16.mxu1 %v1444_v38  ;;  %377 = vmatpush1.bf16.msra.mxu1 %v1310_v39 }
 0x20e   :  { %378 = vmatprep.subr.bf16.mxu1 %v1315_v41  ;;  %v1336_v41 = vld [vmem:[%s1908_s8 + $0x74] ss:$8 sps:$4 sm:$0xff]  }
 0x211   :  { %379 = vmatpush1.bf16.msra.mxu1 %v1313_v42  ;;  %v1339_v42 = vld [vmem:[%s1908_s8 + $0x64] ss:$8 sps:$4 sm:$0xff]  }
 0x212   :  { %380 = vmatprep.subr.bf16.mxu1 %v1318_v43  ;;  %v1337_v43 = vld [vmem:[%s1908_s8 + $0x60] ss:$8 sps:$4 sm:$0xff]  }
 0x215   :  { %381 = vmatpush1.bf16.msra.mxu1 %v1316_v44  ;;  %v1342_v44 = vld [vmem:[%s1908_s8 + $0x54] ss:$8 sps:$4 sm:$0xff]  }
 0x216   :  { %382 = vmatprep.subr.bf16.mxu1 %v1321_v45  ;;  %v1340_v45 = vld [vmem:[%s1908_s8 + $0x50] ss:$8 sps:$4 sm:$0xff]  }
 0x219   :  { %383 = vmatpush1.bf16.msra.mxu1 %v1319_v46  ;;  %v1345_v46 = vld [vmem:[%s1908_s8 + $0x44] ss:$8 sps:$4 sm:$0xff]  }
 0x21a   :  { %384 = vmatprep.subr.bf16.mxu1 %v1324_v47  ;;  %v1343_v47 = vld [vmem:[%s1908_s8 + $0x40] ss:$8 sps:$4 sm:$0xff]  }
 0x21d   :  { %385 = vmatpush1.bf16.msra.mxu1 %v1322_v48  ;;  %v1348_v48 = vld [vmem:[%s1908_s8 + $0x34] ss:$8 sps:$4 sm:$0xff]  }
 0x21e   :  { %386 = vmatprep.subr.bf16.mxu1 %v1327_v49  ;;  %v1346_v49 = vld [vmem:[%s1908_s8 + $0x30] ss:$8 sps:$4 sm:$0xff]  }
 0x221   :  { %387 = vmatpush1.bf16.msra.mxu1 %v1325_v50  ;;  %v1351_v50 = vld [vmem:[%s1908_s8 + $0x24] ss:$8 sps:$4 sm:$0xff]  }
 0x222   :  { %388 = vmatprep.subr.bf16.mxu1 %v1330_v51  ;;  %v1349_v51 = vld [vmem:[%s1908_s8 + $0x20] ss:$8 sps:$4 sm:$0xff]  }
 0x225   :  { %389 = vmatpush1.bf16.msra.mxu1 %v1328_v52  ;;  %v1354_v52 = vld [vmem:[%s1908_s8 + $0x14] ss:$8 sps:$4 sm:$0xff]  }
 0x226   :  { %390 = vmatprep.subr.bf16.mxu1 %v1333_v53  ;;  %v1352_v53 = vld [vmem:[%s1908_s8 + $0x10] ss:$8 sps:$4 sm:$0xff]  }
 0x229   :  { %391 = vmatpush1.bf16.msra.mxu1 %v1331_v54  ;;  %v1357_v54 = vld [vmem:[%s1908_s8 + $0x4] ss:$8 sps:$4 sm:$0xff]  }
 0x22a   :  { %805 = vmatprep.subr.bf16.mxu1 %v1336_v41  ;;  %v1417_v41 = vld [vmem:[%s1909_s10 + $0xc4] ss:$8 sps:$4 sm:$0xff]  }
 0x2c4   :  { %v1536_v23 = vpop.f32.mrf.mxu1 }
 0x2c5   :  { %v185_v10 = vpack.c.bf16 %v1536_v23, %v1536_v23  ;;  %v48_v23 = vld [vmem:[%s1906_s0] sm:$0xff] }
 0x2c6   :  { %v1266_v24 = vpop.f32.mrf.mxu1 }
 0x2c7   :  { %v1641_v24 = vsub.s32 1, %v543_v21  ;;  %v1393_v21 = vld [vmem:[%s1909_s10 + $0x44] ss:$8 sps:$4 sm:$0xff]  }
 0x2c8   :  { %v182_v25 = vpop.f32.mrf.mxu1 }
 0x2ca   :  { %v1267_v26 = vpop.f32.mrf.mxu1 }
 0x2cb   :  { %v540_v26 = vld [vmem:[%s1907_s5] sm:$0x3] }
 0x2cc   :  { %v228_v27 = vpop.f32.mrf.mxu1 }
 0x2cd   :  { %v234_v28 = vsel %vm125_vm1, %v228_v27, -inf }
 0x2ce   :  { %235 = vmax.xlane.f32.xlu1 %v234_v28  ;;  %v1272_v29 = vpop.f32.mrf.mxu1  ;;  %v49_v28 = vld [vmem:[%s1906_s0 + $0x8] sm:$0xff] }
 0x2d0   :  { %v231_v30 = vpop.f32.mrf.mxu1 }
 0x2d2   :  { %v1273_v31 = vpop.f32.mrf.mxu1 }
 0x2d3   :  { %v545_v31 = vrot.slane %v540_v26, %v1639_v22 }
 0x357   :  { %v236_v32 = vpop.xlane.xlu1 %235 }
 0x358   :  { %v237_v33 = vsub.f32 %v228_v27, %v236_v32 }
 0x35a   :  { %v238_v34 = vmul.f32 1.442695, %v237_v33  ;;  %v549_v33 = vrot.slane %v540_v26, %v1641_v24  ;;  %v1394_v26 = vld [vmem:[%s1909_s10 + $0x30] ss:$8 sps:$4 sm:$0xff]  }
 0x35c   :  { %1434 = vpow2.f32 %v238_v34 }
 0x369   :  { %v1435_v35 = vpop.eup %1434 }
 0x36a   :  { %v240_v36 = vsel %vm125_vm1, %v1435_v35, 0.0 }
 0x36b   :  { %241 = vadd.xlane.f32.xlu1 %v240_v36 }
 0x3f4   :  { %v242_v55 = vpop.xlane.xlu1 %241 }
 0x3f5   :  { %1436 = vrcp.f32 %v242_v55  ;;  %v1355_v55 = vld [vmem:[%s1908_s8] ss:$8 sps:$4 sm:$0xff]  }
 0x402   :  { %v1437_v56 = vpop.eup %1436 }
 0x403   :  { %v244_v57 = vmul.f32 %v1437_v56, %v1435_v35  ;;  %v1360_v56 = vld [vmem:[%s1908_s8 + $0xf4] ss:$8 sps:$4 sm:$0xff]  }
 0x405   :  { %v245_v59 = vpack.c.bf16 %v244_v57, %v244_v57  ;;  %v1358_v57 = vld [vmem:[%s1908_s8 + $0xf0] ss:$8 sps:$4 sm:$0xff]  }
 0x407   :  { %1277 = vmatmul.mubr.msk.bf16.vlgmr.msra.gmra.mxu0 %vm125_vm1, %v245_v59  ;;  %v1361_v59 = vld [vmem:[%s1908_s8 + $0xe0] ss:$8 sps:$4 sm:$0xff]  }
 0x408   :  { %498 = vmatpush1.bf16.msra.mxu0 %v1286_v58  ;;  %529 = vmatprep.mubr.bf16.mxu0 %v1444_v38  ;;  %v1363_v58 = vld [vmem:[%s1908_s8 + $0xe4] ss:$8 sps:$4 sm:$0xff]  }
 0x409   :  { %499 = vmatprep.subr.bf16.mxu0 %v1291_v60 }
 0x40c   :  { %500 = vmatpush1.bf16.msra.mxu0 %v1289_v61 }
 0x40d   :  { %501 = vmatprep.subr.bf16.mxu0 %v1294_v62 }
 0x410   :  { %502 = vmatpush1.bf16.msra.mxu0 %v1292_v63 }
 0x411   :  { %503 = vmatprep.subr.bf16.mxu0 %v1297_v0 }
 0x414   :  { %504 = vmatpush1.bf16.msra.mxu0 %v1295_v1 }
 0x415   :  { %505 = vmatprep.subr.bf16.mxu0 %v1300_v2 }
 0x418   :  { %506 = vmatpush1.bf16.msra.mxu0 %v1298_v3  ;;  %v1366_v3 = vld [vmem:[%s1908_s8 + $0xd4] ss:$8 sps:$4 sm:$0xff]  }
 0x419   :  { %507 = vmatprep.subr.bf16.mxu0 %v1303_v4  ;;  %v1364_v4 = vld [vmem:[%s1908_s8 + $0xd0] ss:$8 sps:$4 sm:$0xff]  }
 0x41c   :  { %508 = vmatpush1.bf16.msra.mxu0 %v1301_v5  ;;  %v1369_v5 = vld [vmem:[%s1908_s8 + $0xc4] ss:$8 sps:$4 sm:$0xff]  }
 0x41d   :  { %509 = vmatprep.subr.bf16.mxu0 %v1306_v6  ;;  %v1367_v6 = vld [vmem:[%s1908_s8 + $0xc0] ss:$8 sps:$4 sm:$0xff]  }
 0x420   :  { %510 = vmatpush1.bf16.msra.mxu0 %v1304_v7  ;;  %v1372_v7 = vld [vmem:[%s1908_s8 + $0xb4] ss:$8 sps:$4 sm:$0xff]  }
 0x421   :  { %511 = vmatprep.subr.bf16.mxu0 %v1309_v8  ;;  %v1370_v8 = vld [vmem:[%s1908_s8 + $0xb0] ss:$8 sps:$4 sm:$0xff]  }
 0x424   :  { %512 = vmatpush1.bf16.msra.mxu0 %v1307_v9  ;;  %v1375_v9 = vld [vmem:[%s1908_s8 + $0xa4] ss:$8 sps:$4 sm:$0xff]  }
 0x427   :  { %530 = vmatmul.mubr.bf16.vlgmr.msra.gmra.mxu0 %v185_v10  ;;  %v1373_v10 = vld [vmem:[%s1908_s8 + $0xa0] ss:$8 sps:$4 sm:$0xff]  }
 0x4c7   :  { %v289_v11 = vpop.f32.mrf.mxu0 }
 0x4c8   :  { %v295_v12 = vpack.c.bf16 %v289_v11, %v289_v11  ;;  %v1378_v11 = vld [vmem:[%s1908_s8 + $0x94] ss:$8 sps:$4 sm:$0xff]  }
 0x4c9   :  { %v1278_v13 = vpop.f32.mrf.mxu0 }
 0x4ca   :  { %409 = vmatmul.mubr.bf16.vlgmr.msra.gmra.mxu1 %v295_v12  ;;  %v1376_v12 = vld [vmem:[%s1908_s8 + $0x90] ss:$8 sps:$4 sm:$0xff]   ;;  %v1381_v13 = vld [vmem:[%s1908_s8 + $0x84] ss:$8 sps:$4 sm:$0xff]  }
 0x4cb   :  { %v292_v14 = vpop.f32.mrf.mxu0  ;;  %806 = vmatpush1.bf16.msra.mxu1 %v1334_v40  ;;  %v1412_v40 = vld [vmem:[%s1909_s10 + $0xd0] ss:$8 sps:$4 sm:$0xff]  }
 0x4cc   :  { %807 = vmatprep.subr.bf16.mxu1 %v1339_v42  ;;  %v1379_v14 = vld [vmem:[%s1908_s8 + $0x80] ss:$8 sps:$4 sm:$0xff]  }
 0x4cd   :  { %v1279_v15 = vpop.f32.mrf.mxu0  ;;  %v1415_v42 = vld [vmem:[%s1909_s10 + $0xc0] ss:$8 sps:$4 sm:$0xff]  }
 0x4ce   :  { %v1382_v15 = vld [vmem:[%s1909_s10 + $0x70] ss:$8 sps:$4 sm:$0xff]  }
 0x4cf   :  { %808 = vmatpush1.bf16.msra.mxu1 %v1337_v43  ;;  %v1420_v43 = vld [vmem:[%s1909_s10 + $0xb4] ss:$8 sps:$4 sm:$0xff]  }
 0x4d0   :  { %809 = vmatprep.subr.bf16.mxu1 %v1342_v44  ;;  %v1418_v44 = vld [vmem:[%s1909_s10 + $0xb0] ss:$8 sps:$4 sm:$0xff]  }
 0x4d3   :  { %810 = vmatpush1.bf16.msra.mxu1 %v1340_v45  ;;  %v1423_v45 = vld [vmem:[%s1909_s10 + $0xa4] ss:$8 sps:$4 sm:$0xff]  }
 0x4d4   :  { %811 = vmatprep.subr.bf16.mxu1 %v1345_v46  ;;  %v1421_v46 = vld [vmem:[%s1909_s10 + $0xa0] ss:$8 sps:$4 sm:$0xff]  }
 0x4d7   :  { %812 = vmatpush1.bf16.msra.mxu1 %v1343_v47 }
 0x4d8   :  { %813 = vmatprep.subr.bf16.mxu1 %v1348_v48 }
 0x4db   :  { %814 = vmatpush1.bf16.msra.mxu1 %v1346_v49 }
 0x4dc   :  { %815 = vmatprep.subr.bf16.mxu1 %v1351_v50  ;;  %v554_v50 = vld [vmem:[%s1910_s6] sm:$0x3] }
 0x4df   :  { %816 = vmatpush1.bf16.msra.mxu1 %v1349_v51  ;;  %v555_v51 = vld [vmem:[%s1911_s7] sm:$0x3] }
 0x4e0   :  { %817 = vmatprep.subr.bf16.mxu1 %v1354_v52  ;;  %v577_v52 = vrot.slane %v554_v50, %v1639_v22 }
 0x4e3   :  { %818 = vmatpush1.bf16.msra.mxu1 %v1352_v53  ;;  %v581_v53 = vrot.slane %v554_v50, %v1641_v24 }
 0x4e4   :  { %819 = vmatprep.subr.bf16.mxu1 %v1357_v54 }
 0x4e7   :  { %v531_v16 = vpop.f32.mrf.mxu0  ;;  %820 = vmatpush1.bf16.msra.mxu1 %v1355_v55 }
 0x4e8   :  { %821 = vmatprep.subr.bf16.mxu1 %v1360_v56  ;;  %v590_v56 = vrot.slane %v555_v51, %v1639_v22 }
 0x4e9   :  { %v533_v17 = vpop.f32.mrf.mxu0 }
 0x4eb   :  { %v535_v18 = vpop.f32.mrf.mxu0  ;;  %822 = vmatpush2.bf16.msra.mxu1 %v1358_v57  ;;  %v594_v57 = vrot.slane %v555_v51, %v1641_v24 }
 0x4ec   :  { %823 = vmatprep.subr.bf16.mxu1 %v1363_v58  ;;  %v1385_v18 = vld [vmem:[%s1909_s10 + $0x60] ss:$8 sps:$4 sm:$0xff]  }
 0x4ed   :  { %v536_v19 = vpop.f32.mrf.mxu0 }
 0x4ee   :  { %v1390_v19 = vld [vmem:[%s1909_s10 + $0x54] ss:$8 sps:$4 sm:$0xff]  }
 0x4ef   :  { %824 = vmatpush2.bf16.msra.mxu1 %v1361_v59 }
 0x4f0   :  { %825 = vmatprep.subr.bf16.mxu1 %v1366_v3  ;;  %v1426_v3 = vld [vmem:[%s1909_s10 + $0x94] ss:$8 sps:$4 sm:$0xff]  }
 0x4f3   :  { %826 = vmatpush2.bf16.msra.mxu1 %v1364_v4  ;;  %v1427_v4 = vld [vmem:[%s1909_s10 + $0x80] ss:$8 sps:$4 sm:$0xff]  }
 0x4f4   :  { %827 = vmatprep.subr.bf16.mxu1 %v1369_v5  ;;  %v633_v5 = vld [vmem:[%s1912_s9] sm:$0x3] }
 0x4f7   :  { %828 = vmatpush2.bf16.msra.mxu1 %v1367_v6  ;;  %v638_v6 = vrot.slane %v633_v5, %v1639_v22 }
 0x4f8   :  { %829 = vmatprep.subr.bf16.mxu1 %v1372_v7  ;;  %v642_v7 = vrot.slane %v633_v5, %v1641_v24 }
 0x4fb   :  { %830 = vmatpush2.bf16.msra.mxu1 %v1370_v8 }
 0x4fc   :  { %831 = vmatprep.subr.bf16.mxu1 %v1375_v9 }
 0x4ff   :  { %832 = vmatpush2.bf16.msra.mxu1 %v1373_v10 }
 0x500   :  { %833 = vmatprep.subr.bf16.mxu1 %v1378_v11 }
 0x503   :  { %834 = vmatpush2.bf16.msra.mxu1 %v1376_v12 }
 0x504   :  { %835 = vmatprep.subr.bf16.mxu1 %v1381_v13 }
 0x507   :  { %836 = vmatpush2.bf16.msra.mxu1 %v1379_v14 }
 0x58a   :  { %v410_v25 = vpop.f32.mrf.mxu1 }
 0x58b   :  { %v532_v27 = vadd.f32 %v531_v16, %v410_v25  ;;  %v1384_v16 = vld [vmem:[%s1909_s10 + $0x74] ss:$8 sps:$4 sm:$0xff]  }
 0x58c   :  { %v412_v29 = vpop.f32.mrf.mxu1  ;;  %1054 = vmatprep.subr.bf16.mxu0 %v1384_v16  ;;  %v1396_v25 = vld [vmem:[%s1909_s10 + $0x34] ss:$8 sps:$4 sm:$0xff]  }
 0x58d   :  { %v538_v30 = vadd.f32 %v532_v27, %v48_v23  ;;  %v534_v32 = vadd.f32 %v533_v17, %v412_v29  ;;  %v1387_v17 = vld [vmem:[%s1909_s10 + $0x64] ss:$8 sps:$4 sm:$0xff]   ;;  %1055 = vmatpush1.bf16.msra.mxu0 %v1382_v15  ;;  %v1391_v23 = vld [vmem:[%s1909_s10 + $0x40] ss:$8 sps:$4 sm:$0xff]   ;;  %v1402_v29 = vld [vmem:[%s1909_s10 + $0x14] ss:$8 sps:$4 sm:$0xff]  }
 0x58e   :  { %v414_v34 = vpop.f32.mrf.mxu1  ;;  %1056 = vmatprep.subr.bf16.mxu0 %v1387_v17  ;;  %v1399_v27 = vld [vmem:[%s1909_s10 + $0x24] ss:$8 sps:$4 sm:$0xff]  }
 0x58f   :  { %v539_v35 = vadd.f32 %v534_v32, %v49_v28  ;;  %v1654_v37 = vadd.f32 %v545_v31, %v538_v30  ;;  %v1397_v28 = vld [vmem:[%s1909_s10 + $0x20] ss:$8 sps:$4 sm:$0xff]   ;;  %v1400_v30 = vld [vmem:[%s1909_s10 + $0x10] ss:$8 sps:$4 sm:$0xff]   ;;  %v1405_v31 = vld [vmem:[%s1909_s10 + $0x4] ss:$8 sps:$4 sm:$0xff]  }
 0x590   :  { %v415_v36 = vpop.f32.mrf.mxu1  ;;  %v1403_v32 = vld [vmem:[%s1909_s10] ss:$8 sps:$4 sm:$0xff]   ;;  %v1406_v34 = vld [vmem:[%s1909_s10 + $0xf0] ss:$8 sps:$4 sm:$0xff]  }
 0x591   :  { %v1656_v38 = vadd.f32 %v549_v33, %v539_v35  ;;  %1057 = vmatpush1.bf16.msra.mxu0 %v1385_v18  ;;  %v1408_v33 = vld [vmem:[%s1909_s10 + $0xf4] ss:$8 sps:$4 sm:$0xff]   ;;  %v1411_v35 = vld [vmem:[%s1909_s10 + $0xe4] ss:$8 sps:$4 sm:$0xff]   ;;  %v1409_v36 = vld [vmem:[%s1909_s10 + $0xe0] ss:$8 sps:$4 sm:$0xff]  }
 0x592   :  { %1058 = vmatprep.subr.bf16.mxu0 %v1390_v19  ;;  %v882_v18 = vld [vmem:[%s1913_s11] sm:$0x3] }
 0x593   :  { %v556_v39 = vadd.f32 %v1656_v38, %v1654_v37  ;;  %v887_v19 = vrot.slane %v882_v18, %v1639_v22 }
 0x595   :  { %557 = vadd.xlane.f32.xlu0 %v556_v39  ;;  %1059 = vmatpush1.bf16.msra.mxu0 %v1388_v20  ;;  %v1414_v39 = vld [vmem:[%s1909_s10 + $0xd4] ss:$8 sps:$4 sm:$0xff]   ;;  %v891_v20 = vrot.slane %v882_v18, %v1641_v24 }
 0x596   :  { %1060 = vmatprep.subr.bf16.mxu0 %v1393_v21 }
 0x599   :  { %1061 = vmatpush1.bf16.msra.mxu0 %v1391_v23 }
 0x59a   :  { %1062 = vmatprep.subr.bf16.mxu0 %v1396_v25 }
 0x59d   :  { %1063 = vmatpush1.bf16.msra.mxu0 %v1394_v26 }
 0x59e   :  { %1064 = vmatprep.subr.bf16.mxu0 %v1399_v27 }
 0x5a1   :  { %1065 = vmatpush1.bf16.msra.mxu0 %v1397_v28 }
 0x5a2   :  { %1066 = vmatprep.subr.bf16.mxu0 %v1402_v29 }
 0x5a5   :  { %1067 = vmatpush1.bf16.msra.mxu0 %v1400_v30 }
 0x5a6   :  { %1068 = vmatprep.subr.bf16.mxu0 %v1405_v31 }
 0x5a9   :  { %1069 = vmatpush1.bf16.msra.mxu0 %v1403_v32 }
 0x5aa   :  { %1070 = vmatprep.subr.bf16.mxu0 %v1408_v33 }
 0x5ad   :  { %1071 = vmatpush2.bf16.msra.mxu0 %v1406_v34 }
 0x5ae   :  { %1072 = vmatprep.subr.bf16.mxu0 %v1411_v35 }
 0x5b1   :  { %1073 = vmatpush2.bf16.msra.mxu0 %v1409_v36 }
 0x5b2   :  { %1074 = vmatprep.subr.bf16.mxu0 %v1414_v39 }
 0x5b5   :  { %1075 = vmatpush2.bf16.msra.mxu0 %v1412_v40 }
 0x5b6   :  { %1076 = vmatprep.subr.bf16.mxu0 %v1417_v41 }
 0x5b9   :  { %1077 = vmatpush2.bf16.msra.mxu0 %v1415_v42 }
 0x5ba   :  { %1078 = vmatprep.subr.bf16.mxu0 %v1420_v43 }
 0x5bd   :  { %1079 = vmatpush2.bf16.msra.mxu0 %v1418_v44 }
 0x5be   :  { %1080 = vmatprep.subr.bf16.mxu0 %v1423_v45 }
 0x5c1   :  { %1081 = vmatpush2.bf16.msra.mxu0 %v1421_v46 }
 0x5c2   :  { %1082 = vmatprep.subr.bf16.mxu0 %v1426_v3 }
 0x61e   :  { %v558_v60 = vpop.xlane.xlu0 %557 }
 0x61f   :  { %v560_v61 = vmul.f32 0.00390625, %v558_v60 }
 0x621   :  { %v1721_v62 = vsub.f32 %v1654_v37, %v560_v61  ;;  %v1724_v63 = vsub.f32 %v1656_v38, %v560_v61 }
 0x623   :  { %v563_v0 = vmul.f32 %v1721_v62, %v1721_v62  ;;  %v564_v1 = vmul.f32 %v1724_v63, %v1724_v63 }
 0x625   :  { %v565_v2 = vadd.f32 %v564_v1, %v563_v0 }
 0x627   :  { %566 = vadd.xlane.f32.xlu1 %v565_v2 }
 0x6b0   :  { %v567_v47 = vpop.xlane.xlu1 %566 }
 0x6b1   :  { %v568_v48 = vmul.f32 0.00390625, %v567_v47 }
 0x6b3   :  { %v569_v49 = vadd.f32 1e-12, %v568_v48 }
 0x6b5   :  { %1438 = vrsqrt.f32 %v569_v49 }
 0x6c2   :  { %v1439_v54 = vpop.eup %1438 }
 0x6c3   :  { %v572_v55 = vmul.f32 %v1439_v54, %v1724_v63  ;;  %v571_v58 = vmul.f32 %v1439_v54, %v1721_v62  ;;  %v1424_v63 = vld [vmem:[%s1909_s10 + $0x90] ss:$8 sps:$4 sm:$0xff]   ;;  %v1429_v62 = vld [vmem:[%s1909_s10 + $0x84] ss:$8 sps:$4 sm:$0xff]  }
 0x6c4   :  { %1083 = vmatpush2.bf16.msra.mxu0 %v1424_v63 }
 0x6c5   :  { %v585_v59 = vmul.f32 %v581_v53, %v572_v55  ;;  %v584_v60 = vmul.f32 %v577_v52, %v571_v58  ;;  %1084 = vmatprep.subr.bf16.mxu0 %v1429_v62 }
 0x6c7   :  { %v598_v61 = vadd.f32 %v594_v57, %v585_v59  ;;  %v597_v0 = vadd.f32 %v590_v56, %v584_v60 }
 0x6c8   :  { %1085 = vmatpush2.bf16.msra.mxu0 %v1427_v4 }
 0x6c9   :  { %v600_v1 = vpack.c.bf16 %v598_v61, %v598_v61  ;;  %v599_v2 = vpack.c.bf16 %v597_v0, %v597_v0 }
 0x6cb   :  { %837 = vmatprep.mubr.bf16.mxu1 %v600_v1 }
 0x6cc   :  { %838 = vmatmul.mubr.bf16.vlgmr.msra.gmra.mxu1 %v599_v2 }
 0x78c   :  { %v839_v8 = vpop.f32.mrf.mxu1 }
 0x78d   :  { %v840_v9 = vadd.f32 %v839_v8, %v638_v6 }
 0x78e   :  { %v841_v10 = vpop.f32.mrf.mxu1 }
 0x78f   :  { %v842_v11 = vadd.f32 %v841_v10, %v642_v7  ;;  %v846_v12 = vmax.f32 %v840_v9, 0.0 }
 0x790   :  { %v843_v13 = vpop.f32.mrf.mxu1 }
 0x791   :  { %v847_v14 = vmax.f32 %v842_v11, 0.0  ;;  %v848_v17 = vpack.c.bf16 %v846_v12, %v846_v12 }
 0x792   :  { %v844_v15 = vpop.f32.mrf.mxu1 }
 0x793   :  { %v849_v16 = vpack.c.bf16 %v847_v14, %v847_v14 }
 0x795   :  { %1086 = vmatprep.mubr.bf16.mxu0 %v849_v16 }
 0x796   :  { %1087 = vmatmul.mubr.bf16.vlgmr.msra.gmra.mxu0 %v848_v17 }
 0x856   :  { %v1088_v21 = vpop.f32.mrf.mxu0 }
 0x857   :  { %v1089_v23 = vadd.f32 %v1088_v21, %v887_v19 }
 0x858   :  { %v1090_v25 = vpop.f32.mrf.mxu0 }
 0x859   :  { %v1091_v26 = vadd.f32 %v1090_v25, %v891_v20  ;;  %v1095_v28 = vadd.f32 %v1089_v23, %v1654_v37  ;;  %v1097_v37 = vld [vmem:[%s1914_s12] sm:$0x3] }
 0x85a   :  { %v1092_v27 = vpop.f32.mrf.mxu0  ;;  %v1119_v44 = vrot.slane %v1097_v37, %v1639_v22  ;;  %v1123_v45 = vrot.slane %v1097_v37, %v1641_v24 }
 0x85b   :  { %v1096_v29 = vadd.f32 %v1091_v26, %v1656_v38  ;;  %v1098_v38 = vld [vmem:[%s1915_s13] sm:$0x3] }
 0x85c   :  { %v1093_v30 = vpop.f32.mrf.mxu0  ;;  %v1132_v47 = vrot.slane %v1098_v38, %v1639_v22  ;;  %v1136_v48 = vrot.slane %v1098_v38, %v1641_v24 }
 0x85d   :  { %v1099_v31 = vadd.f32 %v1096_v29, %v1095_v28 }
 0x85f   :  { %1100 = vadd.xlane.f32.xlu0 %v1099_v31 }
 0x8e8   :  { %v1101_v32 = vpop.xlane.xlu0 %1100 }
 0x8e9   :  { %v1102_v33 = vmul.f32 0.00390625, %v1101_v32 }
 0x8eb   :  { %v1103_v34 = vsub.f32 %v1095_v28, %v1102_v33  ;;  %v1104_v35 = vsub.f32 %v1096_v29, %v1102_v33 }
 0x8ed   :  { %v1105_v36 = vmul.f32 %v1103_v34, %v1103_v34  ;;  %v1106_v39 = vmul.f32 %v1104_v35, %v1104_v35 }
 0x8ef   :  { %v1107_v40 = vadd.f32 %v1106_v39, %v1105_v36 }
 0x8f1   :  { %1108 = vadd.xlane.f32.xlu1 %v1107_v40 }
 0x97a   :  { %v1109_v41 = vpop.xlane.xlu1 %1108 }
 0x97b   :  { %v1110_v42 = vmul.f32 0.00390625, %v1109_v41 }
 0x97d   :  { %v1111_v43 = vadd.f32 1e-12, %v1110_v42 }
 0x97f   :  { %1440 = vrsqrt.f32 %v1111_v43 }
 0x98c   :  { %v1441_v46 = vpop.eup %1440 }
 0x98d   :  { %v1113_v49 = vmul.f32 %v1441_v46, %v1103_v34  ;;  %v1114_v50 = vmul.f32 %v1441_v46, %v1104_v35 }
 0x98f   :  { %v1126_v51 = vmul.f32 %v1119_v44, %v1113_v49  ;;  %v1127_v52 = vmul.f32 %v1123_v45, %v1114_v50 }
 0x991   :  { %v1139_v53 = vadd.f32 %v1132_v47, %v1126_v51  ;;  %v1140_v54 = vadd.f32 %v1136_v48, %v1127_v52 }
 0x993   :  { %1141 = vst [vmem:[%s1916_s14] sm:$0xff] %v1139_v53  ;;  %1142 = vst [vmem:[%s1916_s14 + $0x8] sm:$0xff] %v1140_v54 }

// kernel: _encoder_half.5
= control target key start
LH: loop header
LB: loop body
LE: loop exit
PB: predicated region body
PF: predicated region fallthrough
CT: control target
= control target key end

     0   :  { %v41_v17 = vlaneseq  ;;  %vm1374_vm4 = vmmov 0   ;;  %s1745_s1 = inlined_call_operand.vmem [shape: bf16[768,128], index: 1, kind: input, shape index: {}]   ;;  %s1746_s0 = inlined_call_operand.vmem [shape: f32[8,256], index: 0, kind: input, shape index: {}]   ;;  %s1747_s2 = inlined_call_operand.vmem [shape: f32[1,128], index: 2, kind: input, shape index: {}]   ;;  %s1748_s5 = inlined_call_operand.vmem [shape: bf16[384,128], index: 5, kind: input, shape index: {}]   ;;  %s1749_s3 = inlined_call_operand.vmem [shape: f32[1,128], index: 3, kind: input, shape index: {}]   ;;  %s1750_s4 = inlined_call_operand.vmem [shape: f32[1,128], index: 4, kind: input, shape index: {}]   ;;  %s1751_s6 = inlined_call_operand.vmem [shape: f32[1,128], index: 6, kind: input, shape index: {}]   ;;  %s1752_s9 = inlined_call_operand.vmem [shape: bf16[128,128], index: 9, kind: input, shape index: {}]   ;;  %s1753_s7 = inlined_call_operand.vmem [shape: f32[1,128], index: 7, kind: input, shape index: {}]   ;;  %s1754_s8 = inlined_call_operand.vmem [shape: f32[1,128], index: 8, kind: input, shape index: {}]   ;;  %s1755_s10 = inlined_call_operand.vmem [shape: f32[1,128], index: 10, kind: input, shape index: {}]   ;;  %s1756_s11 = inlined_call_operand.vmem [shape: f32[8,128], index: 11, kind: output, shape index: {}]  }
   0x1   :  { %v1289_v0 = vld [vmem:[%s1745_s1 + $0x78] sm:$0xff]   ;;  %v1293_v4 = vld [vmem:[%s1745_s1 + $0x70] sm:$0xff]   ;;  %v1297_v8 = vld [vmem:[%s1745_s1 + $0x68] sm:$0xff]  }
   0x2   :  { %v1290_v1 = vld [vmem:[%s1745_s1 + $0x38] sm:$0xff]   ;;  %1141 = vmatprep.subr.bf16.mxu0 %v1289_v0  ;;  %v1294_v5 = vld [vmem:[%s1745_s1 + $0x30] sm:$0xff]   ;;  %v1298_v9 = vld [vmem:[%s1745_s1 + $0x28] sm:$0xff]   ;;  %v42_v22 = vshrl.u32 %v41_v17, 7 }
   0x3   :  { %v1291_v2 = vld [vmem:[%s1745_s1 + $0xf8] sm:$0xff]   ;;  %1142 = vmatpush3.bf16.msra.mxu0 %v1290_v1  ;;  %v1295_v6 = vld [vmem:[%s1745_s1 + $0xf0] sm:$0xff]   ;;  %v1299_v10 = vld [vmem:[%s1745_s1 + $0xe8] sm:$0xff]  }
   0x4   :  { %v1292_v3 = vld [vmem:[%s1745_s1 + $0xb8] sm:$0xff]   ;;  %1163 = vmatprep.subr.bf16.mxu1 %v1291_v2  ;;  %1143 = vmatprep.subr.bf16.mxu0 %v1293_v4  ;;  %v1296_v7 = vld [vmem:[%s1745_s1 + $0xb0] sm:$0xff]   ;;  %v1300_v11 = vld [vmem:[%s1745_s1 + $0xa8] sm:$0xff]   ;;  %v45_v27 = vadd.s32 4294967295, %v42_v22  ;;  %v53_v29 = vadd.s32 1, %v42_v22 }
   0x5   :  { %1164 = vmatpush3.bf16.msra.mxu1 %v1292_v3  ;;  %v1301_v12 = vld [vmem:[%s1745_s1 + $0x60] sm:$0xff]   ;;  %v1305_v16 = vld [vmem:[%s1745_s1 + $0x58] sm:$0xff]   ;;  %v1309_v21 = vld [vmem:[%s1745_s1 + $0x50] sm:$0xff]  }
   0x6   :  { %1165 = vmatprep.subr.bf16.mxu1 %v1295_v6  ;;  %v1302_v13 = vld [vmem:[%s1745_s1 + $0x20] sm:$0xff]   ;;  %v1306_v18 = vld [vmem:[%s1745_s1 + $0x18] sm:$0xff]   ;;  %v1310_v23 = vld [vmem:[%s1745_s1 + $0x10] sm:$0xff]   ;;  %vm46_vm0 = vcmp.ge.s32.totalorder %v45_v27, 0  ;;  %vm55_vm1 = vcmp.lt.s32.totalorder %v53_v29, 8 }
   0x7   :  { %1144 = vmatpush3.bf16.msra.mxu0 %v1294_v5  ;;  %v1303_v14 = vld [vmem:[%s1745_s1 + $0xe0] sm:$0xff]   ;;  %v1307_v19 = vld [vmem:[%s1745_s1 + $0xd8] sm:$0xff]   ;;  %v1311_v24 = vld [vmem:[%s1745_s1 + $0xd0] sm:$0xff]  }
   0x8   :  { %1145 = vmatprep.subr.bf16.mxu0 %v1297_v8  ;;  %v1304_v15 = vld [vmem:[%s1745_s1 + $0xa0] sm:$0xff]   ;;  %v1308_v20 = vld [vmem:[%s1745_s1 + $0x98] sm:$0xff]   ;;  %v1312_v25 = vld [vmem:[%s1745_s1 + $0x90] sm:$0xff]  }
   0x9   :  { %1166 = vmatpush3.bf16.msra.mxu1 %v1296_v7  ;;  %v1313_v26 = vld [vmem:[%s1745_s1 + $0x48] sm:$0xff]   ;;  %v1317_v32 = vld [vmem:[%s1745_s1 + $0x40] sm:$0xff]   ;;  %vm1534_vm2 = vmpackc.low %vm46_vm0, %vm46_vm0 }
   0xa   :  { %1167 = vmatprep.subr.bf16.mxu1 %v1299_v10  ;;  %v1314_v28 = vld [vmem:[%s1745_s1 + $0x8] sm:$0xff]   ;;  %v1318_v33 = vld [vmem:[%s1745_s1] sm:$0xff]   ;;  %vm1541_vm3 = vmpackc.low %vm55_vm1, %vm55_vm1 }
   0xb   :  { %1146 = vmatpush3.bf16.msra.mxu0 %v1298_v9  ;;  %v1315_v30 = vld [vmem:[%s1745_s1 + $0xc8] sm:$0xff]   ;;  %v1319_v34 = vld [vmem:[%s1745_s1 + $0xc0] sm:$0xff]   ;;  %v1321_v44 = vld [vmem:[%s1745_s1 + $0x178] sm:$0xff]  }
   0xc   :  { %1147 = vmatprep.subr.bf16.mxu0 %v1301_v12  ;;  %v1316_v31 = vld [vmem:[%s1745_s1 + $0x88] sm:$0xff]   ;;  %v39_v35 = vld [vmem:[%s1746_s0] sm:$0xff]  ;;  %v1322_v49 = vld [vmem:[%s1745_s1 + $0x138] sm:$0xff]  }
   0xd   :  { %1168 = vmatpush3.bf16.msra.mxu1 %v1300_v11  ;;  %v40_v36 = vld [vmem:[%s1746_s0 + $0x8] sm:$0xff]  ;;  %v1320_v40 = vld [vmem:[%s1745_s1 + $0x80] sm:$0xff]   ;;  %v43_v43 = vrot.slane %v39_v35, 7  ;;  %v61_v45 = vpack.c.bf16 %v39_v35, %v39_v35  ;;  %v1323_v50 = vld [vmem:[%s1745_s1 + $0x170] sm:$0xff]   ;;  %v51_v63 = vrot.slane %v39_v35, 1 }
   0xe   :  { %1169 = vmatprep.subr.bf16.mxu1 %v1303_v14  ;;  %v44_v38 = vrot.slane %v40_v36, 7  ;;  %v52_v39 = vrot.slane %v40_v36, 1  ;;  %v62_v41 = vpack.c.bf16 %v40_v36, %v40_v36  ;;  %v1324_v51 = vld [vmem:[%s1745_s1 + $0x130] sm:$0xff]   ;;  %v1325_v52 = vld [vmem:[%s1745_s1 + $0x168] sm:$0xff]   ;;  %v1327_v54 = vld [vmem:[%s1745_s1 + $0x160] sm:$0xff]  }
   0xf   :  { %1148 = vmatpush3.bf16.msra.mxu0 %v1302_v13  ;;  %v1089_v48 = vpack.c.bf16 %v43_v43, %v43_v43  ;;  %v1326_v53 = vld [vmem:[%s1745_s1 + $0x128] sm:$0xff]   ;;  %v1328_v55 = vld [vmem:[%s1745_s1 + $0x120] sm:$0xff]   ;;  %v1329_v56 = vld [vmem:[%s1745_s1 + $0x158] sm:$0xff]   ;;  %v1095_v1 = vpack.c.bf16 %v51_v63, %v51_v63 }
  0x10   :  { %1149 = vmatprep.subr.bf16.mxu0 %v1305_v16  ;;  %v1086_v46 = vpack.c.bf16 %v44_v38, %v44_v38  ;;  %v1092_v47 = vpack.c.bf16 %v52_v39, %v52_v39  ;;  %528 = vmatprep.mubr.bf16.mxu1 %v62_v41  ;;  %v1330_v57 = vld [vmem:[%s1745_s1 + $0x118] sm:$0xff]   ;;  %v1331_v58 = vld [vmem:[%s1745_s1 + $0x150] sm:$0xff]   ;;  %v1333_v60 = vld [vmem:[%s1745_s1 + $0x148] sm:$0xff]  }
  0x11   :  { %1170 = vmatpush3.bf16.msra.mxu1 %v1304_v15  ;;  %v1332_v59 = vld [vmem:[%s1745_s1 + $0x110] sm:$0xff]   ;;  %v1334_v61 = vld [vmem:[%s1745_s1 + $0x108] sm:$0xff]   ;;  %v1335_v62 = vld [vmem:[%s1745_s1 + $0x140] sm:$0xff]  }
  0x12   :  { %1171 = vmatprep.subr.bf16.mxu1 %v1307_v19  ;;  %1087 = vmatprep.mubr.msk.bf16.mxu0 %vm1534_vm2, %v1086_v46  ;;  %v1336_v0 = vld [vmem:[%s1745_s1 + $0x100] sm:$0xff]   ;;  %v1337_v22 = vld [vmem:[%s1748_s5 + $0x78] sm:$0xff]   ;;  %v1345_v35 = vld [vmem:[%s1748_s5 + $0xa8] sm:$0xff]  }
  0x13   :  { %1150 = vmatpush3.bf16.msra.mxu0 %v1306_v18  ;;  %v1036_v11 = vld [vmem:[%s1747_s2] ss:$0 sm:$0xff]  ;;  %v1350_v41 = vld [vmem:[%s1748_s5 + $0x18] sm:$0xff]   ;;  %v1354_v46 = vld [vmem:[%s1748_s5 + $0x90] sm:$0xff]  }
  0x14   :  { %1151 = vmatprep.subr.bf16.mxu0 %v1309_v21  ;;  %v1346_v36 = vld [vmem:[%s1748_s5 + $0x60] sm:$0xff]   ;;  %v1351_v43 = vld [vmem:[%s1748_s5 + $0x98] sm:$0xff]  }
  0x15   :  { %1172 = vmatpush3.bf16.msra.mxu1 %v1308_v20  ;;  %v1347_v38 = vld [vmem:[%s1748_s5 + $0x20] sm:$0xff]  }
  0x16   :  { %1173 = vmatprep.subr.bf16.mxu1 %v1311_v24  ;;  %v1338_v24 = vld [vmem:[%s1748_s5 + $0x38] sm:$0xff]   ;;  %v1348_v39 = vld [vmem:[%s1748_s5 + $0xa0] sm:$0xff]  }
  0x17   :  { %1152 = vmatpush3.bf16.msra.mxu0 %v1310_v23  ;;  %v1373_v23 = vmov 0.0  }
  0x18   :  { %1153 = vmatprep.subr.bf16.mxu0 %v1313_v26 }
  0x19   :  { %1174 = vmatpush3.bf16.msra.mxu1 %v1312_v25  ;;  %v1339_v25 = vld [vmem:[%s1748_s5 + $0xb8] sm:$0xff]  }
  0x1a   :  { %1175 = vmatprep.subr.bf16.mxu1 %v1315_v30  ;;  %v1340_v30 = vld [vmem:[%s1748_s5 + $0x70] sm:$0xff]  }
  0x1b   :  { %1154 = vmatpush3.bf16.msra.mxu0 %v1314_v28 }
  0x1c   :  { %1155 = vmatprep.subr.bf16.mxu0 %v1317_v32  ;;  %v1342_v32 = vld [vmem:[%s1748_s5 + $0xb0] sm:$0xff]  }
  0x1d   :  { %1176 = vmatpush3.bf16.msra.mxu1 %v1316_v31  ;;  %v1341_v31 = vld [vmem:[%s1748_s5 + $0x30] sm:$0xff]  }
  0x1e   :  { %1177 = vmatprep.subr.bf16.mxu1 %v1319_v34  ;;  %v1344_v34 = vld [vmem:[%s1748_s5 + $0x28] sm:$0xff]  }
  0x1f   :  { %1156 = vmatpush3.bf16.msra.mxu0 %v1318_v33  ;;  %v1343_v33 = vld [vmem:[%s1748_s5 + $0x68] sm:$0xff]  }
  0x20   :  { %1185 = vmatprep.subr.bf16.mxu0 %v1321_v44  ;;  %v1352_v44 = vld [vmem:[%s1748_s5 + $0x50] sm:$0xff]  }
  0x21   :  { %1178 = vmatpush3.bf16.msra.mxu1 %v1320_v40  ;;  %v1349_v40 = vld [vmem:[%s1748_s5 + $0x58] sm:$0xff]  }
  0x22   :  { %1090 = vmatmul.mubr.msk.bf16.vlgmr.msra.gmra.mxu0 %vm1534_vm2, %v1089_v48  ;;  %1207 = vmatprep.subr.bf16.mxu1 %v1337_v22  ;;  %v1356_v48 = vld [vmem:[%s1748_s5 + $0x8] sm:$0xff]   ;;  %v1365_v22 = vld [vmem:[%s1752_s9 + $0x18] sm:$0xff]  }
  0x23   :  { %1186 = vmatpush3.bf16.msra.mxu0 %v1322_v49  ;;  %1093 = vmatprep.mubr.msk.bf16.mxu0 %vm1541_vm3, %v1092_v47  ;;  %v1355_v47 = vld [vmem:[%s1748_s5 + $0x48] sm:$0xff]  }
  0x24   :  { %529 = vmatmul.mubr.bf16.vlgmr.msra.gmra.mxu1 %v61_v45  ;;  %1187 = vmatprep.subr.bf16.mxu0 %v1323_v50  ;;  %v1353_v45 = vld [vmem:[%s1748_s5 + $0x10] sm:$0xff]   ;;  %v1357_v49 = vld [vmem:[%s1748_s5 + $0x88] sm:$0xff]   ;;  %v1358_v50 = vld [vmem:[%s1748_s5 + $0x40] sm:$0xff]  }
  0x25   :  { %1208 = vmatpush3.bf16.msra.mxu1 %v1338_v24  ;;  %v1366_v24 = vld [vmem:[%s1752_s9 + $0x10] sm:$0xff]  }
  0x26   :  { %1209 = vmatprep.subr.bf16.mxu1 %v1340_v30 }
  0x27   :  { %1188 = vmatpush3.bf16.msra.mxu0 %v1324_v51  ;;  %v1359_v51 = vld [vmem:[%s1748_s5] sm:$0xff]  }
  0x28   :  { %1189 = vmatprep.subr.bf16.mxu0 %v1325_v52  ;;  %v1360_v52 = vld [vmem:[%s1748_s5 + $0x80] sm:$0xff]  }
  0x29   :  { %1210 = vmatpush3.bf16.msra.mxu1 %v1341_v31  ;;  %v1130_v31 = vld [vmem:[%s1753_s7] ss:$0 sm:$0xff] }
  0x2a   :  { %1211 = vmatprep.subr.bf16.mxu1 %v1343_v33  ;;  %v1131_v33 = vld [vmem:[%s1754_s8] ss:$0 sm:$0xff] }
  0x2b   :  { %1190 = vmatpush3.bf16.msra.mxu0 %v1326_v53 }
  0x2c   :  { %1191 = vmatprep.subr.bf16.mxu0 %v1327_v54 }
  0x2d   :  { %1212 = vmatpush3.bf16.msra.mxu1 %v1344_v34 }
  0x2e   :  { %1213 = vmatprep.subr.bf16.mxu1 %v1346_v36 }
  0x2f   :  { %1192 = vmatpush3.bf16.msra.mxu0 %v1328_v55 }
  0x30   :  { %1193 = vmatprep.subr.bf16.mxu0 %v1329_v56 }
  0x31   :  { %1214 = vmatpush3.bf16.msra.mxu1 %v1347_v38 }
  0x32   :  { %1215 = vmatprep.subr.bf16.mxu1 %v1349_v40 }
  0x33   :  { %1194 = vmatpush3.bf16.msra.mxu0 %v1330_v57  ;;  %v1097_v57 = vld [vmem:[%s1749_s3] ss:$0 sm:$0xff] }
  0x34   :  { %1195 = vmatprep.subr.bf16.mxu0 %v1331_v58 }
  0x35   :  { %1216 = vmatpush3.bf16.msra.mxu1 %v1350_v41 }
  0x36   :  { %1217 = vmatprep.subr.bf16.mxu1 %v1352_v44 }
  0x37   :  { %1196 = vmatpush3.bf16.msra.mxu0 %v1332_v59  ;;  %v1098_v59 = vld [vmem:[%s1750_s4] ss:$0 sm:$0xff] }
  0x38   :  { %1197 = vmatprep.subr.bf16.mxu0 %v1333_v60 }
  0x39   :  { %1218 = vmatpush3.bf16.msra.mxu1 %v1353_v45 }
  0x3a   :  { %1219 = vmatprep.subr.bf16.mxu1 %v1355_v47 }
  0x3b   :  { %1198 = vmatpush3.bf16.msra.mxu0 %v1334_v61 }
  0x3c   :  { %1199 = vmatprep.subr.bf16.mxu0 %v1335_v62 }
  0x3d   :  { %1220 = vmatpush3.bf16.msra.mxu1 %v1356_v48 }
  0x3e   :  { %1221 = vmatprep.subr.bf16.mxu1 %v1358_v50 }
  0x3f   :  { %1200 = vmatpush3.bf16.msra.mxu0 %v1336_v0 }
  0x40   :  { %1247 = vmatprep.subr.bf16.mxu0 %v1373_v23 }
  0x41   :  { %1222 = vmatpush3.bf16.msra.mxu1 %v1359_v51 }
  0x42   :  { %1096 = vmatmul.mubr.msk.bf16.vlgmr.msra.gmra.mxu0 %vm1541_vm3, %v1095_v1  ;;  %1267 = vmatprep.subr.bf16.mxu1 %v1373_v23 }
  0x43   :  { %1248 = vmatpush3.bf16.msra.mxu0 %v1339_v25  ;;  %1263 = vmatprep.mubr.msk.bf16.mxu0 %vm1374_vm4, %v1373_v23  ;;  %v1367_v25 = vld [vmem:[%s1752_s9 + $0x8] sm:$0xff]  }
  0x44   :  { %1249 = vmatprep.subr.bf16.mxu0 %v1373_v23 }
  0x47   :  { %1250 = vmatpush3.bf16.msra.mxu0 %v1342_v32 }
  0x48   :  { %1251 = vmatprep.subr.bf16.mxu0 %v1373_v23 }
  0x4b   :  { %1252 = vmatpush3.bf16.msra.mxu0 %v1345_v35 }
  0x4c   :  { %1253 = vmatprep.subr.bf16.mxu0 %v1373_v23 }
  0x4f   :  { %1254 = vmatpush3.bf16.msra.mxu0 %v1348_v39 }
  0x50   :  { %1255 = vmatprep.subr.bf16.mxu0 %v1373_v23 }
  0x53   :  { %1256 = vmatpush3.bf16.msra.mxu0 %v1351_v43 }
  0x54   :  { %1257 = vmatprep.subr.bf16.mxu0 %v1373_v23 }
  0x57   :  { %1258 = vmatpush3.bf16.msra.mxu0 %v1354_v46 }
  0x58   :  { %1259 = vmatprep.subr.bf16.mxu0 %v1373_v23 }
  0x5b   :  { %1260 = vmatpush3.bf16.msra.mxu0 %v1357_v49 }
  0x5c   :  { %1261 = vmatprep.subr.bf16.mxu0 %v1373_v23 }
  0x5f   :  { %1262 = vmatpush3.bf16.msra.mxu0 %v1360_v52 }
  0xe2   :  { %v1157_v2 = vpop.f32.mrf.mxu0 }
  0xe4   :  { %v1179_v3 = vpop.f32.mrf.mxu1  ;;  %v1158_v4 = vpop.f32.mrf.mxu0 }
  0xe5   :  { %v1159_v10 = vadd.f32 %v1158_v4, %v1157_v2 }
  0xe6   :  { %v1180_v5 = vpop.f32.mrf.mxu1  ;;  %v1160_v6 = vpop.f32.mrf.mxu0 }
  0xe7   :  { %v491_v12 = vadd.f32 %v1159_v10, %v1036_v11  ;;  %v1181_v13 = vadd.f32 %v1180_v5, %v1179_v3  ;;  %v1099_v5 = vld [vmem:[%s1751_s6] ss:$0 sm:$0xff] }
  0xe8   :  { %v1182_v7 = vpop.f32.mrf.mxu1  ;;  %v1161_v8 = vpop.f32.mrf.mxu0 }
  0xe9   :  { %v531_v16 = vadd.f32 %v1181_v13, %v491_v12 }
  0xea   :  { %v1183_v9 = vpop.f32.mrf.mxu1 }
 0x102   :  { %v1201_v14 = vpop.f32.mrf.mxu0 }
 0x104   :  { %v1202_v15 = vpop.f32.mrf.mxu0 }
 0x105   :  { %v1203_v17 = vadd.f32 %v1202_v15, %v1201_v14  ;;  %v1361_v14 = vld [vmem:[%s1752_s9 + $0x38] sm:$0xff]   ;;  %v1362_v15 = vld [vmem:[%s1752_s9 + $0x30] sm:$0xff]  }
 0x106   :  { %v1204_v18 = vpop.f32.mrf.mxu0 }
 0x107   :  { %v571_v19 = vadd.f32 %v1203_v17, %v531_v16 }
 0x108   :  { %v1205_v20 = vpop.f32.mrf.mxu0 }
 0x109   :  { %v576_v21 = vmax.f32 %v571_v19, 0.0  ;;  %v1363_v20 = vld [vmem:[%s1752_s9 + $0x28] sm:$0xff]  }
 0x10b   :  { %579 = vadd.xlane.f32.xlu0 %v576_v21 }
 0x194   :  { %v580_v26 = vpop.xlane.xlu0 %579 }
 0x195   :  { %v582_v27 = vmul.f32 0.0078125, %v580_v26  ;;  %v1368_v26 = vld [vmem:[%s1752_s9] sm:$0xff]  }
 0x197   :  { %v583_v28 = vsub.f32 %v576_v21, %v582_v27  ;;  %v1364_v21 = vld [vmem:[%s1752_s9 + $0x20] sm:$0xff]  }
 0x199   :  { %v584_v29 = vmul.f32 %v583_v28, %v583_v28 }
 0x19b   :  { %585 = vadd.xlane.f32.xlu0 %v584_v29 }
 0x224   :  { %v586_v53 = vpop.xlane.xlu0 %585 }
 0x225   :  { %v587_v54 = vmul.f32 0.0078125, %v586_v53 }
 0x227   :  { %v588_v55 = vadd.f32 1e-12, %v587_v54 }
 0x229   :  { %1369 = vrsqrt.f32 %v588_v55 }
 0x236   :  { %v1370_v56 = vpop.eup %1369 }
 0x237   :  { %v590_v58 = vmul.f32 %v1370_v56, %v583_v28 }
 0x239   :  { %v597_v60 = vmul.f32 %v1097_v57, %v590_v58 }
 0x23b   :  { %v604_v61 = vadd.f32 %v1098_v59, %v597_v60 }
 0x23d   :  { %v610_v62 = vpack.c.bf16 %v604_v61, %v604_v61  ;;  %v605_v63 = vrot.slane %v604_v61, 7  ;;  %v607_v0 = vrot.slane %v604_v61, 1 }
 0x23f   :  { %843 = vmatprep.mubr.bf16.mxu1 %v610_v62  ;;  %v1125_v1 = vpack.c.bf16 %v605_v63, %v605_v63  ;;  %v1128_v2 = vpack.c.bf16 %v607_v0, %v607_v0 }
 0x241   :  { %1126 = vmatmul.mubr.msk.bf16.vlgmr.msra.gmra.mxu1 %vm1534_vm2, %v1125_v1  ;;  %1264 = vmatmul.mubr.msk.bf16.vlgmr.msra.gmra.mxu0 %vm1541_vm3, %v1128_v2 }
 0x242   :  { %1283 = vmatprep.mubr.msk.bf16.mxu1 %vm1374_vm4, %v1373_v23  ;;  %1268 = vmatpush3.bf16.msra.mxu1 %v1361_v14 }
 0x243   :  { %1269 = vmatprep.subr.bf16.mxu1 %v1373_v23 }
 0x246   :  { %1270 = vmatpush3.bf16.msra.mxu1 %v1362_v15 }
 0x247   :  { %1271 = vmatprep.subr.bf16.mxu1 %v1373_v23 }
 0x24a   :  { %1272 = vmatpush3.bf16.msra.mxu1 %v1363_v20 }
 0x24b   :  { %1273 = vmatprep.subr.bf16.mxu1 %v1373_v23 }
 0x24e   :  { %1274 = vmatpush3.bf16.msra.mxu1 %v1364_v21 }
 0x24f   :  { %1275 = vmatprep.subr.bf16.mxu1 %v1373_v23 }
 0x252   :  { %1276 = vmatpush3.bf16.msra.mxu1 %v1365_v22 }
 0x253   :  { %1277 = vmatprep.subr.bf16.mxu1 %v1373_v23 }
 0x256   :  { %1278 = vmatpush3.bf16.msra.mxu1 %v1366_v24 }
 0x257   :  { %1279 = vmatprep.subr.bf16.mxu1 %v1373_v23 }
 0x25a   :  { %1280 = vmatpush3.bf16.msra.mxu1 %v1367_v25 }
 0x25b   :  { %1281 = vmatprep.subr.bf16.mxu1 %v1373_v23  ;;  %v1132_v23 = vld [vmem:[%s1755_s10] ss:$0 sm:$0xff] }
 0x25e   :  { %1282 = vmatpush3.bf16.msra.mxu1 %v1368_v26 }
 0x301   :  { %v1223_v3 = vpop.f32.mrf.mxu1  ;;  %v885_v4 = vpop.f32.mrf.mxu0 }
 0x303   :  { %v1224_v6 = vpop.f32.mrf.mxu1  ;;  %v1265_v7 = vpop.f32.mrf.mxu0 }
 0x304   :  { %v1225_v8 = vadd.f32 %v1224_v6, %v1223_v3 }
 0x305   :  { %v1226_v9 = vpop.f32.mrf.mxu1  ;;  %v888_v10 = vpop.f32.mrf.mxu0 }
 0x306   :  { %v846_v11 = vadd.f32 %v1225_v8, %v1099_v5 }
 0x307   :  { %v1227_v37 = vpop.f32.mrf.mxu1  ;;  %v1266_v12 = vpop.f32.mrf.mxu0 }
 0x308   :  { %v886_v13 = vadd.f32 %v885_v4, %v846_v11 }
 0x30a   :  { %v891_v42 = vmax.f32 %v886_v13, 0.0 }
 0x30c   :  { %894 = vadd.xlane.f32.xlu1 %v891_v42 }
 0x395   :  { %v895_v16 = vpop.xlane.xlu1 %894 }
 0x396   :  { %v896_v17 = vmul.f32 0.0078125, %v895_v16 }
 0x398   :  { %v897_v18 = vsub.f32 %v891_v42, %v896_v17 }
 0x39a   :  { %v898_v19 = vmul.f32 %v897_v18, %v897_v18 }
 0x39c   :  { %899 = vadd.xlane.f32.xlu1 %v898_v19 }
 0x425   :  { %v900_v27 = vpop.xlane.xlu1 %899 }
 0x426   :  { %v901_v28 = vmul.f32 0.0078125, %v900_v27 }
 0x428   :  { %v902_v29 = vadd.f32 1e-12, %v901_v28 }
 0x42a   :  { %1371 = vrsqrt.f32 %v902_v29 }
 0x437   :  { %v1372_v30 = vpop.eup %1371 }
 0x438   :  { %v904_v32 = vmul.f32 %v1372_v30, %v897_v18 }
 0x43a   :  { %v911_v34 = vmul.f32 %v1130_v31, %v904_v32 }
 0x43c   :  { %v918_v35 = vadd.f32 %v1131_v33, %v911_v34 }
 0x43e   :  { %v919_v36 = vpack.c.bf16 %v918_v35, %v918_v35 }
 0x440   :  { %1284 = vmatmul.mubr.bf16.vlgmr.msra.gmra.mxu1 %v919_v36 }
 0x500   :  { %v1025_v38 = vpop.f32.mrf.mxu1 }
 0x501   :  { %v1026_v39 = vadd.f32 %v1132_v23, %v1025_v38 }
 0x502   :  { %v1285_v40 = vpop.f32.mrf.mxu1 }
 0x503   :  { %1031 = vst [vmem:[%s1756_s11] sm:$0xff] %v1026_v39 }
 0x504   :  { %v1028_v41 = vpop.f32.mrf.mxu1 }
 0x506   :  { %v1286_v43 = vpop.f32.mrf.mxu1 }

</bundles_post_ra>
